<compile_context>
chip_gen: v6e
topology: v6e:2x2x1
jax: 0.10.0
libtpu: 0.0.40
codegen_flags: <defaults>
</compile_context>

<pallas_src>
import functools

import jax
import jax.numpy as jnp
import numpy as np
from jax.experimental import pallas as pl
from jax.experimental.pallas import tpu as pltpu

BN_EPS = 1e-5


def _fold_bn(gamma, beta, mean, var):
    scale = gamma / jnp.sqrt(var + BN_EPS)
    shift = beta - mean * scale
    return scale, shift


def _rup(n, m=128):
    return ((n + m - 1) // m) * m


def _pad_last(a, target):
    pad = target - a.shape[-1]
    if pad == 0:
        return a
    return jnp.pad(a, [(0, 0)] * (a.ndim - 1) + [(0, pad)])


def _pad2d(a, r, c):
    return jnp.pad(a, ((0, r - a.shape[0]), (0, c - a.shape[1])))


# ----------------------------------------------------------------------------
# Fused MBConv kernel: expand 1x1 -> pad -> depthwise 3x3 -> project 1x1
#                      -> Squeeze-Excite -> (+ residual), all in VMEM.
# Grid: (batch,). Per-batch working set is small (<1 MiB at these shapes).
# ----------------------------------------------------------------------------
def _mbconv_kernel(*refs, stride, has_expand, use_residual):
    if has_expand:
        (x_ref, w1_ref, sh1_ref, wdw_ref, sh2_ref, w3_ref, sh3_ref,
         fc1_ref, fc2_ref, o_ref, xp_ref) = refs
    else:
        (x_ref, wdw_ref, sh2_ref, w3_ref, sh3_ref,
         fc1_ref, fc2_ref, o_ref, xp_ref) = refs

    h_in = xp_ref.shape[0] - 2
    w_in = xp_ref.shape[1] - 2
    c_hid = xp_ref.shape[2]
    h_out, w_out, c_out = o_ref.shape[1], o_ref.shape[2], o_ref.shape[3]

    x = x_ref[0]                                        # [H, W, Cin_p] f32

    # ---- 1x1 expand conv (BN scale pre-folded into w1) + shift + Swish ----
    if has_expand:
        hexp = jnp.dot(
            x.reshape(h_in * w_in, x.shape[-1]).astype(jnp.bfloat16),
            w1_ref[...], preferred_element_type=jnp.float32)
        hexp = hexp + sh1_ref[...]
        hexp = hexp * jax.nn.sigmoid(hexp)              # Swish
        hexp = hexp.reshape(h_in, w_in, c_hid)
    else:
        hexp = x

    # ---- spatial zero-pad into VMEM scratch (no HBM pad pass) ----
    # Full-buffer zero is only ~(H+2)(W+2)C/1024 vregs of stores; cheap & simple.
    xp_ref[...] = jnp.zeros_like(xp_ref)
    xp_ref[pl.ds(1, h_in), pl.ds(1, w_in), :] = hexp

    # ---- depthwise 3x3 (BN scale pre-folded) + shift + Swish ----
    wdw = wdw_ref[...]                                  # [3, 3, Chid_p]
    acc = None
    for kx in range(3):
        # one sublane (W-axis) slice per kx; ky offsets hit the free major axis
        if stride == 1:
            xs = xp_ref[:, pl.ds(kx, w_out), :]         # [H+2, Wout, C]
        else:
            # TODO(synk): strided sublane slice; at real sizes prefer computing
            # stride-1 and subsampling (or reshaping W) to avoid a sublane gather.
            xs = jax.lax.slice(
                xp_ref[...], (0, kx, 0),
                (h_in + 2, kx + (w_out - 1) * stride + 1, c_hid),
                (1, stride, 1))
        for ky in range(3):
            if stride == 1:
                patch = xs[ky:ky + h_out]
            else:
                patch = jax.lax.slice(
                    xs, (ky, 0, 0),
                    (ky + (h_out - 1) * stride + 1, w_out, c_hid),
                    (stride, 1, 1))
            tap = patch * wdw[ky, kx]
            acc = tap if acc is None else acc + tap
    y = acc + sh2_ref[...]
    y = y * jax.nn.sigmoid(y)                           # [Hout, Wout, Chid_p]

    # ---- 1x1 project conv (BN scale pre-folded) + shift ----
    z = jnp.dot(y.reshape(h_out * w_out, c_hid).astype(jnp.bfloat16),
                w3_ref[...], preferred_element_type=jnp.float32)
    z = z + sh3_ref[...]                                # [Hout*Wout, Cout_p]

    # ---- Squeeze-Excite on VPU/XLU (tiny K/N would waste whole MXU passes) ----
    pooled = jnp.mean(z, axis=0, keepdims=True)                       # [1, Cout_p]
    se = jnp.sum(pooled * fc1_ref[...], axis=-1, keepdims=True)       # [R, 1]
    se = se * jax.nn.sigmoid(se)                                      # Swish
    gate = jax.nn.sigmoid(jnp.sum(se * fc2_ref[...], axis=0, keepdims=True))
    z = z * gate                                                      # broadcast

    out = z.reshape(h_out, w_out, c_out)
    if use_residual:
        out = out + x        # cin_p == cout_p and stride == 1 when residual
    o_ref[0] = out.astype(o_ref.dtype)


# ----------------------------------------------------------------------------
# Full MBConvBlock forward (NCHW in / NCHW out, like PyTorch)
# ----------------------------------------------------------------------------
def mbconv_forward(x_nchw, params, *, expand_ratio, stride, use_residual):
    # TODO(synk): keep the model NHWC end-to-end at real sizes; the transposes
    # here exist only to match the PyTorch NCHW interface at this boundary.
    x = jnp.transpose(x_nchw, (0, 2, 3, 1)).astype(jnp.float32)   # -> NHWC
    b, h, w, cin = x.shape
    hid = params["wdw"].shape[-1]
    cout = params["w3"].shape[1]
    cr = params["fc1"].shape[1]

    cin_p, hid_p, cout_p = _rup(cin), _rup(hid), _rup(cout)
    cr_p = max(8, ((cr + 7) // 8) * 8)
    has_expand = expand_ratio != 1

    # --- fold BN scales into conv weights; zero-pad channels to 128 lanes ---
    sc2, sh2 = _fold_bn(params["bn2_g"], params["bn2_b"],
                        params["bn2_m"], params["bn2_v"])
    wdwf = _pad_last(params["wdw"] * sc2[None, None, :], hid_p).astype(jnp.float32)
    sh2p = _pad_last(sh2[None, :], hid_p).astype(jnp.float32)

    sc3, sh3 = _fold_bn(params["bn3_g"], params["bn3_b"],
                        params["bn3_m"], params["bn3_v"])
    w3f = _pad2d(params["w3"] * sc3[None, :], hid_p, cout_p).astype(jnp.bfloat16)
    sh3p = _pad_last(sh3[None, :], cout_p).astype(jnp.float32)

    fc1t = _pad2d(params["fc1"].T, cr_p, cout_p).astype(jnp.float32)  # [R, Cout_p]
    fc2p = _pad2d(params["fc2"], cr_p, cout_p).astype(jnp.float32)    # [R, Cout_p]

    xpad = _pad_last(x, cin_p)

    hout = (h + 2 - 3) // stride + 1
    wout = (w + 2 - 3) // stride + 1

    args = [xpad]
    in_specs = [pl.BlockSpec((1, h, w, cin_p), lambda i: (i, 0, 0, 0))]

    if has_expand:
        sc1, sh1 = _fold_bn(params["bn1_g"], params["bn1_b"],
                            params["bn1_m"], params["bn1_v"])
        w1f = _pad2d(params["w1"] * sc1[None, :], cin_p, hid_p).astype(jnp.bfloat16)
        sh1p = _pad_last(sh1[None, :], hid_p).astype(jnp.float32)
        args += [w1f, sh1p]
        in_specs += [pl.BlockSpec((cin_p, hid_p), lambda i: (0, 0)),
                     pl.BlockSpec((1, hid_p), lambda i: (0, 0))]

    args += [wdwf, sh2p, w3f, sh3p, fc1t, fc2p]
    in_specs += [
        pl.BlockSpec((3, 3, hid_p), lambda i: (0, 0, 0)),
        pl.BlockSpec((1, hid_p), lambda i: (0, 0)),
        pl.BlockSpec((hid_p, cout_p), lambda i: (0, 0)),
        pl.BlockSpec((1, cout_p), lambda i: (0, 0)),
        pl.BlockSpec((cr_p, cout_p), lambda i: (0, 0)),
        pl.BlockSpec((cr_p, cout_p), lambda i: (0, 0)),
    ]

    kern = functools.partial(_mbconv_kernel, stride=stride,
                             has_expand=has_expand, use_residual=use_residual)

    # TODO(synk): at real EfficientNet resolutions, additionally tile H
    # (grid=(B, H_tiles)) with halo handling and set vmem_limit_bytes so the
    # per-step footprint fits v7x's 64 MiB VMEM and feeds both TensorCores.
    out = pl.pallas_call(
        kern,
        out_shape=jax.ShapeDtypeStruct((b, hout, wout, cout_p), jnp.float32),
        grid=(b,),
        in_specs=in_specs,
        out_specs=pl.BlockSpec((1, hout, wout, cout_p), lambda i: (i, 0, 0, 0)),
        scratch_shapes=[pltpu.VMEM((h + 2, w + 2, hid_p), jnp.float32)],
        compiler_params=pltpu.CompilerParams(dimension_semantics=("parallel",)),
    )(*args)

    out = out[..., :cout]
    return jnp.transpose(out, (0, 3, 1, 2))                          # -> NCHW


# ----------------------------------------------------------------------------
# Pure-JAX f32 reference (same eval-mode BN semantics as the PyTorch module)
# ----------------------------------------------------------------------------
def mbconv_reference(x_nchw, params, *, expand_ratio, stride, use_residual):
    x = jnp.transpose(x_nchw, (0, 2, 3, 1)).astype(jnp.float32)
    y = x
    if expand_ratio != 1:
        sc1, sh1 = _fold_bn(params["bn1_g"], params["bn1_b"],
                            params["bn1_m"], params["bn1_v"])
        y = jnp.einsum("bhwc,cd->bhwd", y, params["w1"]) * sc1 + sh1
        y = y * jax.nn.sigmoid(y)
    yp = jnp.pad(y, ((0, 0), (1, 1), (1, 1), (0, 0)))
    hout = (y.shape[1] + 2 - 3) // stride + 1
    wout = (y.shape[2] + 2 - 3) // stride + 1
    acc = jnp.zeros((y.shape[0], hout, wout, y.shape[3]), jnp.float32)
    for ky in range(3):
        for kx in range(3):
            patch = yp[:, ky:ky + (hout - 1) * stride + 1:stride,
                       kx:kx + (wout - 1) * stride + 1:stride, :]
            acc = acc + patch * params["wdw"][ky, kx]
    sc2, sh2 = _fold_bn(params["bn2_g"], params["bn2_b"],
                        params["bn2_m"], params["bn2_v"])
    y = acc * sc2 + sh2
    y = y * jax.nn.sigmoid(y)
    sc3, sh3 = _fold_bn(params["bn3_g"], params["bn3_b"],
                        params["bn3_m"], params["bn3_v"])
    z = jnp.einsum("bhwc,cd->bhwd", y, params["w3"]) * sc3 + sh3
    pooled = jnp.mean(z, axis=(1, 2))
    s = pooled @ params["fc1"]
    s = s * jax.nn.sigmoid(s)
    s = jax.nn.sigmoid(s @ params["fc2"])
    z = z * s[:, None, None, :]
    if use_residual:
        z = z + x
    return jnp.transpose(z, (0, 3, 1, 2))


if __name__ == "__main__":
    # Module config: MBConvBlock(in=32, out=32, expand_ratio=2, stride=1)
    in_channels, out_channels, expand_ratio, stride = 32, 32, 2, 1
    use_residual = (in_channels == out_channels) and (stride == 1)
    hidden = in_channels * expand_ratio           # 64
    reduced = out_channels // 16                  # SE reduction=16 -> 2
    B, H, W = 2, 16, 16

    key = jax.random.PRNGKey(0)
    ks = jax.random.split(key, 16)
    rnd = lambda k, shp: (0.1 * jax.random.normal(k, shp)).astype(jnp.float32)
    pos = lambda k, shp: (jnp.abs(jax.random.normal(k, shp)) + 0.5).astype(jnp.float32)

    params = {
        # expand 1x1 conv (PyTorch [hid,in,1,1] -> stored as [in,hid])
        "w1": rnd(ks[0], (in_channels, hidden)),
        "bn1_g": rnd(ks[1], (hidden,)) + 1.0, "bn1_b": rnd(ks[2], (hidden,)),
        "bn1_m": rnd(ks[3], (hidden,)),       "bn1_v": pos(ks[4], (hidden,)),
        # depthwise 3x3 conv (PyTorch [hid,1,3,3] -> stored as [3,3,hid])
        "wdw": rnd(ks[5], (3, 3, hidden)),
        "bn2_g": rnd(ks[6], (hidden,)) + 1.0, "bn2_b": rnd(ks[7], (hidden,)),
        "bn2_m": rnd(ks[8], (hidden,)),       "bn2_v": pos(ks[9], (hidden,)),
        # project 1x1 conv (PyTorch [out,hid,1,1] -> stored as [hid,out])
        "w3": rnd(ks[10], (hidden, out_channels)),
        "bn3_g": rnd(ks[11], (out_channels,)) + 1.0, "bn3_b": rnd(ks[12], (out_channels,)),
        "bn3_m": rnd(ks[13], (out_channels,)),       "bn3_v": pos(ks[14], (out_channels,)),
        # SE linears, bias=False (stored [in_features, out_features])
        "fc1": rnd(jax.random.fold_in(ks[15], 0), (out_channels, reduced)),
        "fc2": rnd(jax.random.fold_in(ks[15], 1), (reduced, out_channels)),
    }

    x = jax.random.normal(jax.random.fold_in(key, 99),
                          (B, in_channels, H, W), jnp.float32)

    fwd = jax.jit(functools.partial(mbconv_forward, expand_ratio=expand_ratio,
                                    stride=stride, use_residual=use_residual))
    out = jax.block_until_ready(fwd(x, params))

    ref = jax.block_until_ready(
        mbconv_reference(x, params, expand_ratio=expand_ratio,
                         stride=stride, use_residual=use_residual))

    assert out.shape == (B, out_channels, H // stride, W // stride)
    # bf16 MXU operands -> slightly looser tolerance vs. the all-f32 reference
    np.testing.assert_allclose(np.asarray(out), np.asarray(ref),
                               rtol=2e-2, atol=2e-2)
    print("KERNEL_OK")
</pallas_src>

<mosaic_0001>
module attributes {stable_mosaic.version = 11 : i64} {
  func.func @_mbconv_kernel(%arg0: i32, %arg1: memref<1x16x16x128xf32, #tpu.memory_space<vmem>>, %arg2: memref<128x128xbf16, #tpu.memory_space<vmem>>, %arg3: memref<1x128xf32, #tpu.memory_space<vmem>>, %arg4: memref<3x3x128xf32, #tpu.memory_space<vmem>>, %arg5: memref<1x128xf32, #tpu.memory_space<vmem>>, %arg6: memref<128x128xbf16, #tpu.memory_space<vmem>>, %arg7: memref<1x128xf32, #tpu.memory_space<vmem>>, %arg8: memref<8x128xf32, #tpu.memory_space<vmem>>, %arg9: memref<8x128xf32, #tpu.memory_space<vmem>>, %arg10: memref<1x16x16x128xf32, #tpu.memory_space<vmem>>, %arg11: memref<18x18x128xf32, #tpu.memory_space<vmem>>) attributes {dimension_semantics = [#tpu.dimension_semantics<parallel>], iteration_bounds = array<i64: 2>, scalar_prefetch = 0 : i64, scratch_operands = 1 : i64, tpu.core_type = #tpu.core_type<tc>, window_params = [{transform_indices = @transform_0, window_bounds = array<i64: 1, 16, 16, 128>}, {pipeline_mode = #tpu.pipeline_mode<synchronous>, transform_indices = @transform_1, window_bounds = array<i64: 128, 128>}, {pipeline_mode = #tpu.pipeline_mode<synchronous>, transform_indices = @transform_2, window_bounds = array<i64: 1, 128>}, {pipeline_mode = #tpu.pipeline_mode<synchronous>, transform_indices = @transform_3, window_bounds = array<i64: 3, 3, 128>}, {pipeline_mode = #tpu.pipeline_mode<synchronous>, transform_indices = @transform_4, window_bounds = array<i64: 1, 128>}, {pipeline_mode = #tpu.pipeline_mode<synchronous>, transform_indices = @transform_5, window_bounds = array<i64: 128, 128>}, {pipeline_mode = #tpu.pipeline_mode<synchronous>, transform_indices = @transform_6, window_bounds = array<i64: 1, 128>}, {pipeline_mode = #tpu.pipeline_mode<synchronous>, transform_indices = @transform_7, window_bounds = array<i64: 8, 128>}, {pipeline_mode = #tpu.pipeline_mode<synchronous>, transform_indices = @transform_8, window_bounds = array<i64: 8, 128>}, {transform_indices = @transform_9, window_bounds = array<i64: 1, 16, 16, 128>}]} {
    %c0 = arith.constant 0 : index
    %c0_0 = arith.constant 0 : index
    %c0_1 = arith.constant 0 : index
    %c0_2 = arith.constant 0 : index
    %0 = vector.load %arg1[%c0, %c0_0, %c0_1, %c0_2] : memref<1x16x16x128xf32, #tpu.memory_space<vmem>>, vector<1x16x16x128xf32>
    %1 = vector.shape_cast %0 : vector<1x16x16x128xf32> to vector<16x16x128xf32>
    %2 = vector.shape_cast %1 : vector<16x16x128xf32> to vector<256x128xf32>
    %3 = arith.truncf %2 : vector<256x128xf32> to vector<256x128xbf16>
    %c0_3 = arith.constant 0 : index
    %c0_4 = arith.constant 0 : index
    %4 = vector.load %arg2[%c0_3, %c0_4] : memref<128x128xbf16, #tpu.memory_space<vmem>>, vector<128x128xbf16>
    %cst = arith.constant dense<0.000000e+00> : vector<256x128xf32>
    %5 = tpu.matmul %3, %4, %cst {dimension_numbers = #tpu.dot_dimension_numbers<[1], [0], [0], [1], [0, 0, 1, 1], [], []>} : vector<256x128xbf16>, vector<128x128xbf16>, vector<256x128xf32> -> vector<256x128xf32>
    %c0_5 = arith.constant 0 : index
    %c0_6 = arith.constant 0 : index
    %6 = vector.load %arg3[%c0_5, %c0_6] : memref<1x128xf32, #tpu.memory_space<vmem>>, vector<1x128xf32>
    %7 = vector.broadcast %6 : vector<1x128xf32> to vector<256x128xf32>
    %8 = arith.addf %5, %7 : vector<256x128xf32>
    %9 = arith.negf %8 : vector<256x128xf32>
    %10 = math.exp %9 : vector<256x128xf32>
    %cst_7 = arith.constant 1.000000e+00 : f32
    %11 = vector.broadcast %cst_7 : f32 to vector<256x128xf32>
    %12 = arith.addf %11, %10 : vector<256x128xf32>
    %13 = arith.divf %11, %12 : vector<256x128xf32>
    %14 = arith.mulf %8, %13 : vector<256x128xf32>
    %15 = vector.shape_cast %14 : vector<256x128xf32> to vector<16x16x128xf32>
    %cst_8 = arith.constant 0.000000e+00 : f32
    %16 = vector.broadcast %cst_8 : f32 to vector<18x18x128xf32>
    %c0_9 = arith.constant 0 : index
    %c0_10 = arith.constant 0 : index
    %c0_11 = arith.constant 0 : index
    %17 = vector.load %arg11[%c0_9, %c0_10, %c0_11] : memref<18x18x128xf32, #tpu.memory_space<vmem>>, vector<18x18x128xf32>
    tpu.vector_store %arg11[%c0_9, %c0_10, %c0_11], %16 {strides = array<i32>} : memref<18x18x128xf32, #tpu.memory_space<vmem>>, vector<18x18x128xf32>,
    %c1 = arith.constant 1 : index
    %c1_12 = arith.constant 1 : index
    %c0_13 = arith.constant 0 : index
    %18 = vector.load %arg11[%c1, %c1_12, %c0_13] : memref<18x18x128xf32, #tpu.memory_space<vmem>>, vector<16x16x128xf32>
    tpu.vector_store %arg11[%c1, %c1_12, %c0_13], %15 {strides = array<i32>} : memref<18x18x128xf32, #tpu.memory_space<vmem>>, vector<16x16x128xf32>,
    %c0_14 = arith.constant 0 : index
    %c0_15 = arith.constant 0 : index
    %c0_16 = arith.constant 0 : index
    %19 = vector.load %arg4[%c0_14, %c0_15, %c0_16] : memref<3x3x128xf32, #tpu.memory_space<vmem>>, vector<3x3x128xf32>
    %c0_17 = arith.constant 0 : index
    %c0_18 = arith.constant 0 : index
    %c0_19 = arith.constant 0 : index
    %20 = vector.load %arg11[%c0_17, %c0_18, %c0_19] : memref<18x18x128xf32, #tpu.memory_space<vmem>>, vector<18x16x128xf32>
    %21 = vector.extract_strided_slice %20 {offsets = [0, 0, 0], sizes = [16, 16, 128], strides = [1, 1, 1]} : vector<18x16x128xf32> to vector<16x16x128xf32>
    %22 = vector.extract_strided_slice %19 {offsets = [0, 0, 0], sizes = [1, 1, 128], strides = [1, 1, 1]} : vector<3x3x128xf32> to vector<1x1x128xf32>
    %23 = vector.shape_cast %22 : vector<1x1x128xf32> to vector<128xf32>
    %24 = vector.shape_cast %23 : vector<128xf32> to vector<1x1x128xf32>
    %25 = vector.broadcast %24 : vector<1x1x128xf32> to vector<16x16x128xf32>
    %26 = arith.mulf %21, %25 : vector<16x16x128xf32>
    %27 = vector.extract_strided_slice %20 {offsets = [1, 0, 0], sizes = [16, 16, 128], strides = [1, 1, 1]} : vector<18x16x128xf32> to vector<16x16x128xf32>
    %28 = vector.extract_strided_slice %19 {offsets = [1, 0, 0], sizes = [1, 1, 128], strides = [1, 1, 1]} : vector<3x3x128xf32> to vector<1x1x128xf32>
    %29 = vector.shape_cast %28 : vector<1x1x128xf32> to vector<128xf32>
    %30 = vector.shape_cast %29 : vector<128xf32> to vector<1x1x128xf32>
    %31 = vector.broadcast %30 : vector<1x1x128xf32> to vector<16x16x128xf32>
    %32 = arith.mulf %27, %31 : vector<16x16x128xf32>
    %33 = arith.addf %26, %32 : vector<16x16x128xf32>
    %34 = vector.extract_strided_slice %20 {offsets = [2, 0, 0], sizes = [16, 16, 128], strides = [1, 1, 1]} : vector<18x16x128xf32> to vector<16x16x128xf32>
    %35 = vector.extract_strided_slice %19 {offsets = [2, 0, 0], sizes = [1, 1, 128], strides = [1, 1, 1]} : vector<3x3x128xf32> to vector<1x1x128xf32>
    %36 = vector.shape_cast %35 : vector<1x1x128xf32> to vector<128xf32>
    %37 = vector.shape_cast %36 : vector<128xf32> to vector<1x1x128xf32>
    %38 = vector.broadcast %37 : vector<1x1x128xf32> to vector<16x16x128xf32>
    %39 = arith.mulf %34, %38 : vector<16x16x128xf32>
    %40 = arith.addf %33, %39 : vector<16x16x128xf32>
    %c0_20 = arith.constant 0 : index
    %c1_21 = arith.constant 1 : index
    %c0_22 = arith.constant 0 : index
    %41 = vector.load %arg11[%c0_20, %c1_21, %c0_22] : memref<18x18x128xf32, #tpu.memory_space<vmem>>, vector<18x16x128xf32>
    %42 = vector.extract_strided_slice %41 {offsets = [0, 0, 0], sizes = [16, 16, 128], strides = [1, 1, 1]} : vector<18x16x128xf32> to vector<16x16x128xf32>
    %43 = vector.extract_strided_slice %19 {offsets = [0, 1, 0], sizes = [1, 1, 128], strides = [1, 1, 1]} : vector<3x3x128xf32> to vector<1x1x128xf32>
    %44 = vector.shape_cast %43 : vector<1x1x128xf32> to vector<128xf32>
    %45 = vector.shape_cast %44 : vector<128xf32> to vector<1x1x128xf32>
    %46 = vector.broadcast %45 : vector<1x1x128xf32> to vector<16x16x128xf32>
    %47 = arith.mulf %42, %46 : vector<16x16x128xf32>
    %48 = arith.addf %40, %47 : vector<16x16x128xf32>
    %49 = vector.extract_strided_slice %41 {offsets = [1, 0, 0], sizes = [16, 16, 128], strides = [1, 1, 1]} : vector<18x16x128xf32> to vector<16x16x128xf32>
    %50 = vector.extract_strided_slice %19 {offsets = [1, 1, 0], sizes = [1, 1, 128], strides = [1, 1, 1]} : vector<3x3x128xf32> to vector<1x1x128xf32>
    %51 = vector.shape_cast %50 : vector<1x1x128xf32> to vector<128xf32>
    %52 = vector.shape_cast %51 : vector<128xf32> to vector<1x1x128xf32>
    %53 = vector.broadcast %52 : vector<1x1x128xf32> to vector<16x16x128xf32>
    %54 = arith.mulf %49, %53 : vector<16x16x128xf32>
    %55 = arith.addf %48, %54 : vector<16x16x128xf32>
    %56 = vector.extract_strided_slice %41 {offsets = [2, 0, 0], sizes = [16, 16, 128], strides = [1, 1, 1]} : vector<18x16x128xf32> to vector<16x16x128xf32>
    %57 = vector.extract_strided_slice %19 {offsets = [2, 1, 0], sizes = [1, 1, 128], strides = [1, 1, 1]} : vector<3x3x128xf32> to vector<1x1x128xf32>
    %58 = vector.shape_cast %57 : vector<1x1x128xf32> to vector<128xf32>
    %59 = vector.shape_cast %58 : vector<128xf32> to vector<1x1x128xf32>
    %60 = vector.broadcast %59 : vector<1x1x128xf32> to vector<16x16x128xf32>
    %61 = arith.mulf %56, %60 : vector<16x16x128xf32>
    %62 = arith.addf %55, %61 : vector<16x16x128xf32>
    %c0_23 = arith.constant 0 : index
    %c2 = arith.constant 2 : index
    %c0_24 = arith.constant 0 : index
    %63 = vector.load %arg11[%c0_23, %c2, %c0_24] : memref<18x18x128xf32, #tpu.memory_space<vmem>>, vector<18x16x128xf32>
    %64 = vector.extract_strided_slice %63 {offsets = [0, 0, 0], sizes = [16, 16, 128], strides = [1, 1, 1]} : vector<18x16x128xf32> to vector<16x16x128xf32>
    %65 = vector.extract_strided_slice %19 {offsets = [0, 2, 0], sizes = [1, 1, 128], strides = [1, 1, 1]} : vector<3x3x128xf32> to vector<1x1x128xf32>
    %66 = vector.shape_cast %65 : vector<1x1x128xf32> to vector<128xf32>
    %67 = vector.shape_cast %66 : vector<128xf32> to vector<1x1x128xf32>
    %68 = vector.broadcast %67 : vector<1x1x128xf32> to vector<16x16x128xf32>
    %69 = arith.mulf %64, %68 : vector<16x16x128xf32>
    %70 = arith.addf %62, %69 : vector<16x16x128xf32>
    %71 = vector.extract_strided_slice %63 {offsets = [1, 0, 0], sizes = [16, 16, 128], strides = [1, 1, 1]} : vector<18x16x128xf32> to vector<16x16x128xf32>
    %72 = vector.extract_strided_slice %19 {offsets = [1, 2, 0], sizes = [1, 1, 128], strides = [1, 1, 1]} : vector<3x3x128xf32> to vector<1x1x128xf32>
    %73 = vector.shape_cast %72 : vector<1x1x128xf32> to vector<128xf32>
    %74 = vector.shape_cast %73 : vector<128xf32> to vector<1x1x128xf32>
    %75 = vector.broadcast %74 : vector<1x1x128xf32> to vector<16x16x128xf32>
    %76 = arith.mulf %71, %75 : vector<16x16x128xf32>
    %77 = arith.addf %70, %76 : vector<16x16x128xf32>
    %78 = vector.extract_strided_slice %63 {offsets = [2, 0, 0], sizes = [16, 16, 128], strides = [1, 1, 1]} : vector<18x16x128xf32> to vector<16x16x128xf32>
    %79 = vector.extract_strided_slice %19 {offsets = [2, 2, 0], sizes = [1, 1, 128], strides = [1, 1, 1]} : vector<3x3x128xf32> to vector<1x1x128xf32>
    %80 = vector.shape_cast %79 : vector<1x1x128xf32> to vector<128xf32>
    %81 = vector.shape_cast %80 : vector<128xf32> to vector<1x1x128xf32>
    %82 = vector.broadcast %81 : vector<1x1x128xf32> to vector<16x16x128xf32>
    %83 = arith.mulf %78, %82 : vector<16x16x128xf32>
    %84 = arith.addf %77, %83 : vector<16x16x128xf32>
    %c0_25 = arith.constant 0 : index
    %c0_26 = arith.constant 0 : index
    %85 = vector.load %arg5[%c0_25, %c0_26] : memref<1x128xf32, #tpu.memory_space<vmem>>, vector<1x128xf32>
    %86 = vector.shape_cast %85 : vector<1x128xf32> to vector<1x1x128xf32>
    %87 = vector.broadcast %86 : vector<1x1x128xf32> to vector<16x16x128xf32>
    %88 = arith.addf %84, %87 : vector<16x16x128xf32>
    %89 = arith.negf %88 : vector<16x16x128xf32>
    %90 = math.exp %89 : vector<16x16x128xf32>
    %cst_27 = arith.constant 1.000000e+00 : f32
    %91 = vector.broadcast %cst_27 : f32 to vector<16x16x128xf32>
    %92 = arith.addf %91, %90 : vector<16x16x128xf32>
    %93 = arith.divf %91, %92 : vector<16x16x128xf32>
    %94 = arith.mulf %88, %93 : vector<16x16x128xf32>
    %95 = vector.shape_cast %94 : vector<16x16x128xf32> to vector<256x128xf32>
    %96 = arith.truncf %95 : vector<256x128xf32> to vector<256x128xbf16>
    %c0_28 = arith.constant 0 : index
    %c0_29 = arith.constant 0 : index
    %97 = vector.load %arg6[%c0_28, %c0_29] : memref<128x128xbf16, #tpu.memory_space<vmem>>, vector<128x128xbf16>
    %cst_30 = arith.constant dense<0.000000e+00> : vector<256x128xf32>
    %98 = tpu.matmul %96, %97, %cst_30 {dimension_numbers = #tpu.dot_dimension_numbers<[1], [0], [0], [1], [0, 0, 1, 1], [], []>} : vector<256x128xbf16>, vector<128x128xbf16>, vector<256x128xf32> -> vector<256x128xf32>
    %c0_31 = arith.constant 0 : index
    %c0_32 = arith.constant 0 : index
    %99 = vector.load %arg7[%c0_31, %c0_32] : memref<1x128xf32, #tpu.memory_space<vmem>>, vector<1x128xf32>
    %100 = vector.broadcast %99 : vector<1x128xf32> to vector<256x128xf32>
    %101 = arith.addf %98, %100 : vector<256x128xf32>
    %cst_33 = arith.constant dense<0.000000e+00> : vector<128xf32>
    %102 = vector.multi_reduction <add>, %101, %cst_33 [0] : vector<256x128xf32> to vector<128xf32>
    %103 = vector.shape_cast %102 : vector<128xf32> to vector<1x128xf32>
    %cst_34 = arith.constant 2.560000e+02 : f32
    %104 = vector.broadcast %cst_34 : f32 to vector<1x128xf32>
    %105 = arith.divf %103, %104 : vector<1x128xf32>
    %c0_35 = arith.constant 0 : index
    %c0_36 = arith.constant 0 : index
    %106 = vector.load %arg8[%c0_35, %c0_36] : memref<8x128xf32, #tpu.memory_space<vmem>>, vector<8x128xf32>
    %107 = vector.broadcast %105 : vector<1x128xf32> to vector<8x128xf32>
    %108 = arith.mulf %107, %106 : vector<8x128xf32>
    %cst_37 = arith.constant dense<0.000000e+00> : vector<8xf32>
    %109 = vector.multi_reduction <add>, %108, %cst_37 [1] : vector<8x128xf32> to vector<8xf32>
    %110 = vector.shape_cast %109 : vector<8xf32> to vector<8x1xf32>
    %111 = arith.negf %110 : vector<8x1xf32>
    %112 = math.exp %111 : vector<8x1xf32>
    %cst_38 = arith.constant 1.000000e+00 : f32
    %113 = vector.broadcast %cst_38 : f32 to vector<8x1xf32>
    %114 = arith.addf %113, %112 : vector<8x1xf32>
    %115 = arith.divf %113, %114 : vector<8x1xf32>
    %116 = arith.mulf %110, %115 : vector<8x1xf32>
    %c0_39 = arith.constant 0 : index
    %c0_40 = arith.constant 0 : index
    %117 = vector.load %arg9[%c0_39, %c0_40] : memref<8x128xf32, #tpu.memory_space<vmem>>, vector<8x128xf32>
    %118 = vector.broadcast %116 : vector<8x1xf32> to vector<8x128xf32>
    %119 = arith.mulf %118, %117 : vector<8x128xf32>
    %cst_41 = arith.constant dense<0.000000e+00> : vector<128xf32>
    %120 = vector.multi_reduction <add>, %119, %cst_41 [0] : vector<8x128xf32> to vector<128xf32>
    %121 = vector.shape_cast %120 : vector<128xf32> to vector<1x128xf32>
    %122 = arith.negf %121 : vector<1x128xf32>
    %123 = math.exp %122 : vector<1x128xf32>
    %cst_42 = arith.constant 1.000000e+00 : f32
    %124 = vector.broadcast %cst_42 : f32 to vector<1x128xf32>
    %125 = arith.addf %124, %123 : vector<1x128xf32>
    %126 = arith.divf %124, %125 : vector<1x128xf32>
    %127 = vector.broadcast %126 : vector<1x128xf32> to vector<256x128xf32>
    %128 = arith.mulf %101, %127 : vector<256x128xf32>
    %129 = vector.shape_cast %128 : vector<256x128xf32> to vector<16x16x128xf32>
    %130 = arith.addf %129, %1 : vector<16x16x128xf32>
    %c0_43 = arith.constant 0 : index
    %c0_44 = arith.constant 0 : index
    %c0_45 = arith.constant 0 : index
    %c0_46 = arith.constant 0 : index
    %131 = vector.load %arg10[%c0_43, %c0_44, %c0_45, %c0_46] : memref<1x16x16x128xf32, #tpu.memory_space<vmem>>, vector<1x16x16x128xf32>
    %132 = vector.shape_cast %131 : vector<1x16x16x128xf32> to vector<16x16x128xf32>
    %133 = vector.shape_cast %130 : vector<16x16x128xf32> to vector<1x16x16x128xf32>
    tpu.vector_store %arg10[%c0_43, %c0_44, %c0_45, %c0_46], %133 {strides = array<i32>} : memref<1x16x16x128xf32, #tpu.memory_space<vmem>>, vector<1x16x16x128xf32>,
    return
  }
  func.func @transform_0(%arg0: i32) -> (i32, i32, i32, i32) {
    %c0_i32 = arith.constant 0 : i32
    %c0_i32_0 = arith.constant 0 : i32
    %c0_i32_1 = arith.constant 0 : i32
    %c0_i32_2 = arith.constant 0 : i32
    return %arg0, %c0_i32, %c0_i32_0, %c0_i32_1 : i32, i32, i32, i32
  }
  func.func @transform_1(%arg0: i32) -> (i32, i32) {
    %c0_i32 = arith.constant 0 : i32
    %c0_i32_0 = arith.constant 0 : i32
    %c0_i32_1 = arith.constant 0 : i32
    return %c0_i32, %c0_i32_0 : i32, i32
  }
  func.func @transform_2(%arg0: i32) -> (i32, i32) {
    %c0_i32 = arith.constant 0 : i32
    %c0_i32_0 = arith.constant 0 : i32
    %c0_i32_1 = arith.constant 0 : i32
    return %c0_i32, %c0_i32_0 : i32, i32
  }
  func.func @transform_3(%arg0: i32) -> (i32, i32, i32) {
    %c0_i32 = arith.constant 0 : i32
    %c0_i32_0 = arith.constant 0 : i32
    %c0_i32_1 = arith.constant 0 : i32
    %c0_i32_2 = arith.constant 0 : i32
    return %c0_i32, %c0_i32_0, %c0_i32_1 : i32, i32, i32
  }
  func.func @transform_4(%arg0: i32) -> (i32, i32) {
    %c0_i32 = arith.constant 0 : i32
    %c0_i32_0 = arith.constant 0 : i32
    %c0_i32_1 = arith.constant 0 : i32
    return %c0_i32, %c0_i32_0 : i32, i32
  }
  func.func @transform_5(%arg0: i32) -> (i32, i32) {
    %c0_i32 = arith.constant 0 : i32
    %c0_i32_0 = arith.constant 0 : i32
    %c0_i32_1 = arith.constant 0 : i32
    return %c0_i32, %c0_i32_0 : i32, i32
  }
  func.func @transform_6(%arg0: i32) -> (i32, i32) {
    %c0_i32 = arith.constant 0 : i32
    %c0_i32_0 = arith.constant 0 : i32
    %c0_i32_1 = arith.constant 0 : i32
    return %c0_i32, %c0_i32_0 : i32, i32
  }
  func.func @transform_7(%arg0: i32) -> (i32, i32) {
    %c0_i32 = arith.constant 0 : i32
    %c0_i32_0 = arith.constant 0 : i32
    %c0_i32_1 = arith.constant 0 : i32
    return %c0_i32, %c0_i32_0 : i32, i32
  }
  func.func @transform_8(%arg0: i32) -> (i32, i32) {
    %c0_i32 = arith.constant 0 : i32
    %c0_i32_0 = arith.constant 0 : i32
    %c0_i32_1 = arith.constant 0 : i32
    return %c0_i32, %c0_i32_0 : i32, i32
  }
  func.func @transform_9(%arg0: i32) -> (i32, i32, i32, i32) {
    %c0_i32 = arith.constant 0 : i32
    %c0_i32_0 = arith.constant 0 : i32
    %c0_i32_1 = arith.constant 0 : i32
    %c0_i32_2 = arith.constant 0 : i32
    return %arg0, %c0_i32, %c0_i32_0, %c0_i32_1 : i32, i32, i32, i32
  }
}

</mosaic_0001>

<bundles_post_ra>
// kernel: mbconv_forward.1
= control target key start
LH: loop header
LB: loop body
LE: loop exit
PB: predicated region body
PF: predicated region fallthrough
CT: control target
= control target key end

     0   :  { %s2966_s30 = smov 0   ;;  %s4498_s0 = inlined_call_operand.vmem [shape: f32[2,16,16,128], index: 0, kind: input, shape index: {}]   ;;  %s4499_s1 = inlined_call_operand.vmem [shape: bf16[128,128], index: 1, kind: input, shape index: {}]   ;;  %s4500_s2 = inlined_call_operand.vmem [shape: f32[1,128], index: 2, kind: input, shape index: {}]   ;;  %s4501_s3 = inlined_call_operand.vmem [shape: f32[3,3,128], index: 3, kind: input, shape index: {}]   ;;  %s4502_s4 = inlined_call_operand.vmem [shape: f32[1,128], index: 4, kind: input, shape index: {}]   ;;  %s4503_s5 = inlined_call_operand.vmem [shape: bf16[128,128], index: 5, kind: input, shape index: {}]   ;;  %s4504_s6 = inlined_call_operand.vmem [shape: f32[1,128], index: 6, kind: input, shape index: {}]   ;;  %s4505_s7 = inlined_call_operand.vmem [shape: f32[8,128], index: 7, kind: input, shape index: {}]   ;;  %s4506_s8 = inlined_call_operand.vmem [shape: f32[8,128], index: 8, kind: input, shape index: {}]   ;;  %s4507_s9 = inlined_call_operand.vmem [shape: f32[2,16,16,128], index: 9, kind: output, shape index: {}]  }
   0x1 LB: > { %s2342_s10 = sadd.s32 4294967295, %s2913_s30   ;;  %p2346_p0 = scmp.ge.s32.totalorder %s2913_s30, 1  ;;  %s2913_s30 = sphi %s2966_s30, %s19_s30  }
   0x2   : > { %p287_p1 = scmp.lt.s32.totalorder %s2913_s30, 3 }
   0x4   : > { %p288_p2 = pnand %p2346_p0, %p287_p1 }
   0x6   : > { %291 = sbr.rel (%p288_p2) target bundleno = 995 (0x3e3), region = 56 }
   0xb   : > { %v2593_v0 = vld [vmem:[%s4499_s1 + $0x38] sm:$0xff]   ;;  %p323_p3 = scmp.lt.s32.totalorder %s2342_s10, 1  ;;  %v2594_v1 = vld [vmem:[%s4499_s1 + $0x30] sm:$0xff]   ;;  %v2595_v2 = vld [vmem:[%s4499_s1 + $0x28] sm:$0xff]   ;;  %v2915_v56 = vmov 0.0  }
   0xc   : > { %2488 = vmatprep.subr.bf16.mxu0 %v2593_v0  ;;  %v2596_v3 = vld [vmem:[%s4499_s1 + $0x20] sm:$0xff]   ;;  %v2597_v7 = vld [vmem:[%s4499_s1 + $0x18] sm:$0xff]   ;;  %v2598_v8 = vld [vmem:[%s4499_s1 + $0x10] sm:$0xff]   ;;  %844 = vst [vmem:[#allocation2 + $0x30] sm:$0xff] %v2915_v56 }
   0xd   : > { %s4544_s10 = smov (!%p323_p3, %s2342_s10), 1  ;;  %2489 = vmatpush3.bf16.msra.mxu0 %v2593_v0  ;;  %v2599_v9 = vld [vmem:[%s4499_s1 + $0x8] sm:$0xff]   ;;  %v2600_v10 = vld [vmem:[%s4499_s1] sm:$0xff]   ;;  %845 = vst [vmem:[#allocation2 + $0x38] sm:$0xff] %v2915_v56  ;;  %838 = vst [vmem:[#allocation2] sm:$0xff] %v2915_v56 }
   0xe   : > { %2490 = vmatprep.subr.bf16.mxu0 %v2594_v1  ;;  %s2438_s17 = sshll.u32 %s4544_s10, 8  ;;  %839 = vst [vmem:[#allocation2 + $0x8] sm:$0xff] %v2915_v56  ;;  %840 = vst [vmem:[#allocation2 + $0x10] sm:$0x3] %v2915_v56  ;;  %v2601_v57 = vld [vmem:[%s4503_s5 + $0x38] sm:$0xff]   ;;  %v2602_v58 = vld [vmem:[%s4503_s5 + $0x30] sm:$0xff]  }
   0xf   : > { %s2991_s20 = scalar_lea.vmem %s4498_s0, %s2438_s17  ;;  %841 = vst [vmem:[#allocation2 + $0x18] sm:$0xff] %v2915_v56  ;;  %842 = vst [vmem:[#allocation2 + $0x20] sm:$0xff] %v2915_v56  ;;  %2536 = vmatprep.subr.bf16.mxu1 %v2601_v57  ;;  %v2603_v59 = vld [vmem:[%s4503_s5 + $0x28] sm:$0xff]   ;;  %v2604_v60 = vld [vmem:[%s4503_s5 + $0x20] sm:$0xff]   ;;  %s4405_s14 = scalar_lea.vmem %s4507_s9, %s2438_s17 }
  0x10   : > { %v334_v4 = vld [vmem:[%s2991_s20] sm:$0xff]  ;;  %v335_v5 = vld [vmem:[%s2991_s20 + $0x8] sm:$0xff]  ;;  %v336_v11 = vld [vmem:[%s2991_s20 + $0x10] sm:$0xff]  ;;  %843 = vst [vmem:[#allocation2 + $0x28] sm:$0x3] %v2915_v56  ;;  %2537 = vmatpush3.bf16.msra.mxu1 %v2601_v57 }
  0x11   : > { %2491 = vmatpush3.bf16.msra.mxu0 %v2594_v1  ;;  %v366_v6 = vpack.c.bf16 %v335_v5, %v334_v4  ;;  %v337_v12 = vld [vmem:[%s2991_s20 + $0x18] sm:$0xff]  ;;  %v338_v13 = vld [vmem:[%s2991_s20 + $0x20] sm:$0xff]  ;;  %v339_v14 = vld [vmem:[%s2991_s20 + $0x28] sm:$0xff]  ;;  %846 = vst [vmem:[#allocation2 + $0x40] sm:$0x3] %v2915_v56  ;;  %2538 = vmatprep.subr.bf16.mxu1 %v2602_v58 }
  0x12   : > { %2492 = vmatprep.subr.bf16.mxu0 %v2595_v2  ;;  %v367_v15 = vpack.c.bf16 %v337_v12, %v336_v11  ;;  %v368_v16 = vpack.c.bf16 %v339_v14, %v338_v13  ;;  %v340_v17 = vld [vmem:[%s2991_s20 + $0x30] sm:$0xff]  ;;  %v341_v18 = vld [vmem:[%s2991_s20 + $0x38] sm:$0xff]  ;;  %v342_v19 = vld [vmem:[%s2991_s20 + $0x40] sm:$0xff]  ;;  %847 = vst [vmem:[#allocation2 + $0x48] sm:$0xff] %v2915_v56 }
  0x13   : > { %2504 = vmatprep.mubr.bf16.mxu0 %v366_v6  ;;  %v343_v20 = vld [vmem:[%s2991_s20 + $0x48] sm:$0xff]  ;;  %v369_v21 = vpack.c.bf16 %v341_v18, %v340_v17  ;;  %v344_v23 = vld [vmem:[%s2991_s20 + $0x50] sm:$0xff]  ;;  %v345_v24 = vld [vmem:[%s2991_s20 + $0x58] sm:$0xff]  ;;  %848 = vst [vmem:[#allocation2 + $0x50] sm:$0xff] %v2915_v56 }
  0x14   : > { %v370_v22 = vpack.c.bf16 %v343_v20, %v342_v19  ;;  %v346_v25 = vld [vmem:[%s2991_s20 + $0x60] sm:$0xff]  ;;  %v347_v26 = vld [vmem:[%s2991_s20 + $0x68] sm:$0xff]  ;;  %v371_v27 = vpack.c.bf16 %v345_v24, %v344_v23  ;;  %v348_v29 = vld [vmem:[%s2991_s20 + $0x70] sm:$0xff]  ;;  %849 = vst [vmem:[#allocation2 + $0x58] sm:$0x3] %v2915_v56  ;;  %2539 = vmatpush3.bf16.msra.mxu1 %v2602_v58 }
  0x15   : > { %2493 = vmatpush3.bf16.msra.mxu0 %v2595_v2  ;;  %v372_v28 = vpack.c.bf16 %v347_v26, %v346_v25  ;;  %v349_v30 = vld [vmem:[%s2991_s20 + $0x78] sm:$0xff]  ;;  %v350_v31 = vld [vmem:[%s2991_s20 + $0x80] sm:$0xff]  ;;  %v351_v32 = vld [vmem:[%s2991_s20 + $0x88] sm:$0xff]  ;;  %850 = vst [vmem:[#allocation2 + $0x60] sm:$0xff] %v2915_v56  ;;  %2540 = vmatprep.subr.bf16.mxu1 %v2603_v59  ;;  %v964_v26 = vlaneseq }
  0x16   : > { %2494 = vmatprep.subr.bf16.mxu0 %v2596_v3  ;;  %v373_v33 = vpack.c.bf16 %v349_v30, %v348_v29  ;;  %v374_v34 = vpack.c.bf16 %v351_v32, %v350_v31  ;;  %v352_v35 = vld [vmem:[%s2991_s20 + $0x90] sm:$0xff]  ;;  %v353_v36 = vld [vmem:[%s2991_s20 + $0x98] sm:$0xff]  ;;  %v354_v37 = vld [vmem:[%s2991_s20 + $0xa0] sm:$0xff]  ;;  %851 = vst [vmem:[#allocation2 + $0x68] sm:$0xff] %v2915_v56 }
  0x17   : > { %v355_v38 = vld [vmem:[%s2991_s20 + $0xa8] sm:$0xff]  ;;  %v375_v39 = vpack.c.bf16 %v353_v36, %v352_v35  ;;  %v356_v41 = vld [vmem:[%s2991_s20 + $0xb0] sm:$0xff]  ;;  %v357_v42 = vld [vmem:[%s2991_s20 + $0xb8] sm:$0xff]  ;;  %852 = vst [vmem:[#allocation2 + $0x70] sm:$0x3] %v2915_v56  ;;  %v965_v36 = vshrl.u32 %v964_v26, 7 }
  0x18   : > { %v376_v40 = vpack.c.bf16 %v355_v38, %v354_v37  ;;  %v358_v43 = vld [vmem:[%s2991_s20 + $0xc0] sm:$0xff]  ;;  %v359_v44 = vld [vmem:[%s2991_s20 + $0xc8] sm:$0xff]  ;;  %v377_v45 = vpack.c.bf16 %v357_v42, %v356_v41  ;;  %v360_v47 = vld [vmem:[%s2991_s20 + $0xd0] sm:$0xff]  ;;  %853 = vst [vmem:[#allocation2 + $0x78] sm:$0xff] %v2915_v56  ;;  %2541 = vmatpush3.bf16.msra.mxu1 %v2603_v59 }
  0x19   : > { %2495 = vmatpush3.bf16.msra.mxu0 %v2596_v3  ;;  %v378_v46 = vpack.c.bf16 %v359_v44, %v358_v43  ;;  %v361_v48 = vld [vmem:[%s2991_s20 + $0xd8] sm:$0xff]  ;;  %v362_v49 = vld [vmem:[%s2991_s20 + $0xe0] sm:$0xff]  ;;  %v363_v50 = vld [vmem:[%s2991_s20 + $0xe8] sm:$0xff]  ;;  %854 = vst [vmem:[#allocation2 + $0x80] sm:$0xff] %v2915_v56  ;;  %2542 = vmatprep.subr.bf16.mxu1 %v2604_v60  ;;  %v966_v42 = vsub.s32 0, %v965_v36 }
  0x1a   : > { %2496 = vmatprep.subr.bf16.mxu0 %v2597_v7  ;;  %v379_v51 = vpack.c.bf16 %v361_v48, %v360_v47  ;;  %v380_v52 = vpack.c.bf16 %v363_v50, %v362_v49  ;;  %v364_v53 = vld [vmem:[%s2991_s20 + $0xf0] sm:$0xff]  ;;  %v365_v54 = vld [vmem:[%s2991_s20 + $0xf8] sm:$0xff]  ;;  %855 = vst [vmem:[#allocation2 + $0x88] sm:$0x3] %v2915_v56  ;;  %856 = vst [vmem:[#allocation2 + $0x90] sm:$0xff] %v2915_v56  ;;  %v1174_v49 = vsub.s32 1, %v965_v36 }
  0x1b   : > { %v381_v55 = vpack.c.bf16 %v365_v54, %v364_v53  ;;  %857 = vst [vmem:[#allocation2 + $0x98] sm:$0xff] %v2915_v56  ;;  %858 = vst [vmem:[#allocation2 + $0xa0] sm:$0x3] %v2915_v56  ;;  %v2605_v61 = vld [vmem:[%s4503_s5 + $0x18] sm:$0xff]   ;;  %v2606_v62 = vld [vmem:[%s4503_s5 + $0x10] sm:$0xff]  }
  0x1c   : > { %859 = vst [vmem:[#allocation2 + $0xa8] sm:$0xff] %v2915_v56  ;;  %860 = vst [vmem:[#allocation2 + $0xb0] sm:$0xff] %v2915_v56  ;;  %2543 = vmatpush3.bf16.msra.mxu1 %v2604_v60  ;;  %v2607_v63 = vld [vmem:[%s4503_s5 + $0x8] sm:$0xff]   ;;  %v2608_v0 = vld [vmem:[%s4503_s5] sm:$0xff]  }
  0x1d   : > { %2497 = vmatpush3.bf16.msra.mxu0 %v2597_v7  ;;  %861 = vst [vmem:[#allocation2 + $0xb8] sm:$0x3] %v2915_v56  ;;  %862 = vst [vmem:[#allocation2 + $0xc0] sm:$0xff] %v2915_v56  ;;  %2544 = vmatprep.subr.bf16.mxu1 %v2605_v61  ;;  %v3067_v1 = vld [vmem:[%s4500_s2] ss:$0 sm:$0xff] }
  0x1e   : > { %2498 = vmatprep.subr.bf16.mxu0 %v2598_v8  ;;  %863 = vst [vmem:[#allocation2 + $0xc8] sm:$0xff] %v2915_v56  ;;  %864 = vst [vmem:[#allocation2 + $0xd0] sm:$0x3] %v2915_v56  ;;  %v925_v48 = vld [vmem:[%s4501_s3] sm:$0x7] }
  0x1f   : > { %865 = vst [vmem:[#allocation2 + $0xd8] sm:$0xff] %v2915_v56  ;;  %866 = vst [vmem:[#allocation2 + $0xe0] sm:$0xff] %v2915_v56  ;;  %v926_v53 = vld [vmem:[%s4501_s3 + $0x4] sm:$0x7]  ;;  %v927_v60 = vld [vmem:[%s4501_s3 + $0x8] sm:$0x7] }
  0x20   : > { %867 = vst [vmem:[#allocation2 + $0xe8] sm:$0x3] %v2915_v56  ;;  %868 = vst [vmem:[#allocation2 + $0xf0] sm:$0xff] %v2915_v56  ;;  %2545 = vmatpush3.bf16.msra.mxu1 %v2605_v61  ;;  %v3154_v26 = vrot.slane %v927_v60, %v966_v42 }
  0x21   : > { %2499 = vmatpush3.bf16.msra.mxu0 %v2598_v8  ;;  %869 = vst [vmem:[#allocation2 + $0xf8] sm:$0xff] %v2915_v56  ;;  %870 = vst [vmem:[#allocation2 + $0x100] sm:$0x3] %v2915_v56  ;;  %2546 = vmatprep.subr.bf16.mxu1 %v2606_v62 }
  0x22   : > { %2500 = vmatprep.subr.bf16.mxu0 %v2599_v9  ;;  %871 = vst [vmem:[#allocation2 + $0x108] sm:$0xff] %v2915_v56  ;;  %872 = vst [vmem:[#allocation2 + $0x110] sm:$0xff] %v2915_v56 }
  0x23   : > { %873 = vst [vmem:[#allocation2 + $0x118] sm:$0x3] %v2915_v56  ;;  %874 = vst [vmem:[#allocation2 + $0x120] sm:$0xff] %v2915_v56 }
  0x24   : > { %875 = vst [vmem:[#allocation2 + $0x128] sm:$0xff] %v2915_v56  ;;  %876 = vst [vmem:[#allocation2 + $0x130] sm:$0x3] %v2915_v56  ;;  %2547 = vmatpush3.bf16.msra.mxu1 %v2606_v62 }
  0x25   : > { %2501 = vmatpush3.bf16.msra.mxu0 %v2599_v9  ;;  %877 = vst [vmem:[#allocation2 + $0x138] sm:$0xff] %v2915_v56  ;;  %878 = vst [vmem:[#allocation2 + $0x140] sm:$0xff] %v2915_v56  ;;  %2548 = vmatprep.subr.bf16.mxu1 %v2607_v63 }
  0x26   : > { %2502 = vmatprep.subr.bf16.mxu0 %v2600_v10  ;;  %879 = vst [vmem:[#allocation2 + $0x148] sm:$0x3] %v2915_v56  ;;  %880 = vst [vmem:[#allocation2 + $0x150] sm:$0xff] %v2915_v56 }
  0x27   : > { %881 = vst [vmem:[#allocation2 + $0x158] sm:$0xff] %v2915_v56  ;;  %882 = vst [vmem:[#allocation2 + $0x160] sm:$0x3] %v2915_v56 }
  0x28   : > { %883 = vst [vmem:[#allocation2 + $0x168] sm:$0xff] %v2915_v56  ;;  %884 = vst [vmem:[#allocation2 + $0x170] sm:$0xff] %v2915_v56  ;;  %2549 = vmatpush3.bf16.msra.mxu1 %v2607_v63  ;;  %v3135_v63 = vrot.slane %v926_v53, %v966_v42 }
  0x29   : > { %2503 = vmatpush3.bf16.msra.mxu0 %v2600_v10  ;;  %885 = vst [vmem:[#allocation2 + $0x178] sm:$0x3] %v2915_v56  ;;  %886 = vst [vmem:[#allocation2 + $0x180] sm:$0xff] %v2915_v56  ;;  %2550 = vmatprep.subr.bf16.mxu1 %v2608_v0 }
  0x2a   : > { %887 = vst [vmem:[#allocation2 + $0x188] sm:$0xff] %v2915_v56  ;;  %888 = vst [vmem:[#allocation2 + $0x190] sm:$0x3] %v2915_v56 }
  0x2b   : > { %889 = vst [vmem:[#allocation2 + $0x198] sm:$0xff] %v2915_v56  ;;  %890 = vst [vmem:[#allocation2 + $0x1a0] sm:$0xff] %v2915_v56 }
  0x2c   : > { %2505 = vmatmul.mubr.bf16.vlgmr.msra.gmra.mxu0 %v367_v15  ;;  %891 = vst [vmem:[#allocation2 + $0x1a8] sm:$0x3] %v2915_v56  ;;  %2551 = vmatpush3.bf16.msra.mxu1 %v2608_v0  ;;  %v3126_v56 = vrot.slane %v925_v48, %v966_v42  ;;  %v3137_v0 = vrot.slane %v925_v48, %v1174_v49 }
  0x2d   : > { %2508 = vmatprep.mubr.bf16.mxu0 %v368_v16 }
  0x2e   : > { %4523 = vst [vmem:[#allocation3_spill] sm:$0xff] %v3126_v56  ;;  %4524 = vst [vmem:[#allocation4_spill] sm:$0xff] %v3137_v0 }
  0x34   : > { %2509 = vmatmul.mubr.bf16.gmra.mxu0 %v369_v21 }
  0x35   : > { %2512 = vmatprep.mubr.bf16.mxu0 %v370_v22 }
  0x3c   : > { %2513 = vmatmul.mubr.bf16.gmra.mxu0 %v371_v27 }
  0x3d   : > { %2516 = vmatprep.mubr.bf16.mxu0 %v372_v28 }
  0x44   : > { %2517 = vmatmul.mubr.bf16.gmra.mxu0 %v373_v33 }
  0x45   : > { %2520 = vmatprep.mubr.bf16.mxu0 %v374_v34 }
  0x4c   : > { %2521 = vmatmul.mubr.bf16.gmra.mxu0 %v375_v39 }
  0x4d   : > { %2524 = vmatprep.mubr.bf16.mxu0 %v376_v40 }
  0x54   : > { %2525 = vmatmul.mubr.bf16.gmra.mxu0 %v377_v45 }
  0x55   : > { %2528 = vmatprep.mubr.bf16.mxu0 %v378_v46 }
  0x5c   : > { %2529 = vmatmul.mubr.bf16.gmra.mxu0 %v379_v51 }
  0x5d   : > { %2532 = vmatprep.mubr.bf16.mxu0 %v380_v52 }
  0x64   : > { %2533 = vmatmul.mubr.bf16.gmra.mxu0 %v381_v55 }
  0xec   : > { %v2506_v2 = vpop.f32.mrf.mxu0 }
  0xed   : > { %v3070_v3 = vadd.f32 %v2506_v2, %v3067_v1  ;;  %v3139_v2 = vrot.slane %v926_v53, %v1174_v49 }
  0xee   : > { %v487_v4 = vpop.f32.mrf.mxu0 }
  0xef   : > { %v2362_v5 = vmul.f32 -1.442695, %v3070_v3  ;;  %v3074_v6 = vadd.f32 %v3067_v1, %v487_v4  ;;  %4525 = vst [vmem:[#allocation5_spill] sm:$0xff] %v3139_v2 }
  0xf0   : > { %v2507_v7 = vpop.f32.mrf.mxu0 }
  0xf1   : > { %2609 = vpow2.f32 %v2362_v5  ;;  %v2360_v8 = vmul.f32 -1.442695, %v3074_v6  ;;  %v3078_v9 = vadd.f32 %v2507_v7, %v3067_v1 }
  0xf2   : > { %v490_v10 = vpop.f32.mrf.mxu0 }
  0xf3   : > { %2611 = vpow2.f32 %v2360_v8  ;;  %v2363_v11 = vmul.f32 -1.442695, %v3078_v9  ;;  %v3082_v12 = vadd.f32 %v3067_v1, %v490_v10  ;;  %v1136_v8 = vld [vmem:[#allocation2 + $0x1] sm:$0xff]  ;;  %v1137_v10 = vld [vmem:[#allocation2 + $0x9] sm:$0xff] }
  0xf4   : > { %v2510_v13 = vpop.f32.mrf.mxu0 }
  0xf5   : > { %2613 = vpow2.f32 %v2363_v11  ;;  %v2361_v14 = vmul.f32 -1.442695, %v3082_v12  ;;  %v3086_v15 = vadd.f32 %v2510_v13, %v3067_v1 }
  0xf6   : > { %v503_v16 = vpop.f32.mrf.mxu0 }
  0xf7   : > { %2615 = vpow2.f32 %v2361_v14  ;;  %v2366_v17 = vmul.f32 -1.442695, %v3086_v15  ;;  %v3090_v18 = vadd.f32 %v3067_v1, %v503_v16  ;;  %v3146_v14 = vmul.f32 0.0, %v3126_v56 }
  0xf8   : > { %v2511_v19 = vpop.f32.mrf.mxu0  ;;  %v3148_v16 = vrot.slane %v927_v60, %v1174_v49 }
  0xf9   : > { %2617 = vpow2.f32 %v2366_v17  ;;  %v2364_v20 = vmul.f32 -1.442695, %v3090_v18  ;;  %v3094_v21 = vadd.f32 %v2511_v19, %v3067_v1  ;;  %v1414_v17 = vsub.s32 2, %v965_v36 }
  0xfa   : > { %v506_v22 = vpop.f32.mrf.mxu0 }
  0xfb   : > { %2619 = vpow2.f32 %v2364_v20  ;;  %v2367_v23 = vmul.f32 -1.442695, %v3094_v21  ;;  %v3098_v24 = vadd.f32 %v3067_v1, %v506_v22 }
  0xfc   : > { %v2514_v25 = vpop.f32.mrf.mxu0 }
  0xfd   : > { %2621 = vpow2.f32 %v2367_v23  ;;  %v2365_v27 = vmul.f32 -1.442695, %v3098_v24  ;;  %v3102_v28 = vadd.f32 %v2514_v25, %v3067_v1 }
  0xfe   : > { %v2610_v29 = vpop.eup %2609  ;;  %v519_v30 = vpop.f32.mrf.mxu0 }
  0xff   : > { %v712_v31 = vadd.f32 1.0, %v2610_v29  ;;  %2623 = vpow2.f32 %v2365_v27  ;;  %v2370_v32 = vmul.f32 -1.442695, %v3102_v28  ;;  %v3106_v33 = vadd.f32 %v3067_v1, %v519_v30 }
 0x100   : > { %v2612_v34 = vpop.eup %2611  ;;  %v2515_v35 = vpop.f32.mrf.mxu0  ;;  %v3157_v27 = vmul.f32 %v3137_v0, %v1136_v8  ;;  %v3160_v29 = vmul.f32 %v3137_v0, %v1137_v10 }
 0x101   : > { %2625 = vrcp.f32 %v712_v31  ;;  %v710_v37 = vadd.f32 1.0, %v2612_v34  ;;  %v2368_v38 = vmul.f32 -1.442695, %v3106_v33  ;;  %v3110_v39 = vadd.f32 %v2515_v35, %v3067_v1  ;;  %v1376_v34 = vld [vmem:[#allocation2 + $0x2] sm:$0xff]  ;;  %v1377_v35 = vld [vmem:[#allocation2 + $0xa] sm:$0xff] }
 0x102   : > { %v2614_v40 = vpop.eup %2613  ;;  %2627 = vpow2.f32 %v2370_v32  ;;  %v522_v41 = vpop.f32.mrf.mxu0 }
 0x103   : > { %2629 = vrcp.f32 %v710_v37  ;;  %v713_v43 = vadd.f32 1.0, %v2614_v40  ;;  %v2371_v44 = vmul.f32 -1.442695, %v3110_v39  ;;  %v3114_v45 = vadd.f32 %v3067_v1, %v522_v41 }
 0x104   : > { %v2616_v46 = vpop.eup %2615  ;;  %2631 = vpow2.f32 %v2368_v38  ;;  %v2518_v47 = vpop.f32.mrf.mxu0  ;;  %v3166_v38 = vrot.slane %v925_v48, %v1414_v17  ;;  %v3168_v40 = vrot.slane %v926_v53, %v1414_v17  ;;  %v3170_v41 = vrot.slane %v927_v60, %v1414_v17 }
 0x105   : > { %2633 = vrcp.f32 %v713_v43  ;;  %v711_v50 = vadd.f32 1.0, %v2616_v46  ;;  %v2369_v51 = vmul.f32 -1.442695, %v3114_v45  ;;  %v3121_v52 = vadd.f32 %v2518_v47, %v3067_v1 }
 0x106   : > { %v2618_v54 = vpop.eup %2617  ;;  %2635 = vpow2.f32 %v2371_v44  ;;  %v535_v55 = vpop.f32.mrf.mxu0  ;;  %v3180_v48 = vmul.f32 %v3166_v38, %v1376_v34 }
 0x107   : > { %2637 = vrcp.f32 %v711_v50  ;;  %v716_v57 = vadd.f32 1.0, %v2618_v54  ;;  %v2374_v58 = vmul.f32 -1.442695, %v3121_v52  ;;  %v3130_v59 = vadd.f32 %v3067_v1, %v535_v55 }
 0x108   : > { %v2620_v61 = vpop.eup %2619  ;;  %2639 = vpow2.f32 %v2369_v51  ;;  %v2519_v62 = vpop.f32.mrf.mxu0  ;;  %v3183_v51 = vmul.f32 %v3166_v38, %v1377_v35 }
 0x109   : > { %2641 = vrcp.f32 %v716_v57  ;;  %v714_v4 = vadd.f32 1.0, %v2620_v61  ;;  %v2372_v5 = vmul.f32 -1.442695, %v3130_v59  ;;  %v3143_v7 = vadd.f32 %v2519_v62, %v3067_v1 }
 0x10a   : > { %v2622_v11 = vpop.eup %2621  ;;  %2643 = vpow2.f32 %v2374_v58  ;;  %v538_v13 = vpop.f32.mrf.mxu0 }
 0x10b   : > { %2645 = vrcp.f32 %v714_v4  ;;  %v717_v19 = vadd.f32 1.0, %v2622_v11  ;;  %v2375_v20 = vmul.f32 -1.442695, %v3143_v7  ;;  %v3152_v22 = vadd.f32 %v3067_v1, %v538_v13 }
 0x10c   : > { %v2624_v23 = vpop.eup %2623  ;;  %2647 = vpow2.f32 %v2372_v5  ;;  %v2522_v25 = vpop.f32.mrf.mxu0 }
 0x10d   : > { %2649 = vrcp.f32 %v717_v19  ;;  %v715_v30 = vadd.f32 1.0, %v2624_v23  ;;  %v2373_v31 = vmul.f32 -1.442695, %v3152_v22  ;;  %v3164_v32 = vadd.f32 %v2522_v25, %v3067_v1 }
 0x10e   : > { %v2626_v36 = vpop.eup %2625  ;;  %2651 = vpow2.f32 %v2375_v20  ;;  %v551_v37 = vpop.f32.mrf.mxu0 }
 0x10f   : > { %v2628_v42 = vpop.eup %2627  ;;  %v3173_v43 = vmul.f32 %v2626_v36, %v3070_v3  ;;  %2653 = vrcp.f32 %v715_v30  ;;  %v2378_v44 = vmul.f32 -1.442695, %v3164_v32  ;;  %v3177_v46 = vadd.f32 %v3067_v1, %v551_v37 }
 0x110   : > { %v2630_v47 = vpop.eup %2629  ;;  %v720_v49 = vadd.f32 1.0, %v2628_v42  ;;  %2655 = vpow2.f32 %v2373_v31  ;;  %v2523_v50 = vpop.f32.mrf.mxu0 }
 0x111   : > { %v2632_v53 = vpop.eup %2631  ;;  %895 = vst [vmem:[#allocation2 + $0x31] sm:$0xff] %v3173_v43  ;;  %v806_v3 = vmul.f32 %v2630_v47, %v3074_v6  ;;  %2657 = vpow2.f32 %v2378_v44  ;;  %v2376_v54 = vmul.f32 -1.442695, %v3177_v46  ;;  %v3189_v55 = vadd.f32 %v2523_v50, %v3067_v1 }
 0x112   : > { %v2634_v57 = vpop.eup %2633  ;;  %2659 = vrcp.f32 %v720_v49  ;;  %v718_v58 = vadd.f32 1.0, %v2632_v53  ;;  %v554_v60 = vpop.f32.mrf.mxu0  ;;  %v3193_v61 = vmul.f32 %v3137_v0, %v3173_v43  ;;  %v3197_v62 = vmul.f32 %v3139_v2, %v3173_v43 }
 0x113   : > { %v2636_v4 = vpop.eup %2635  ;;  %893 = vst [vmem:[#allocation2 + $0x19] sm:$0xff] %v806_v3  ;;  %v3200_v6 = vmul.f32 %v2634_v57, %v3078_v9  ;;  %2661 = vpow2.f32 %v2376_v54  ;;  %v2379_v5 = vmul.f32 -1.442695, %v3189_v55  ;;  %v3204_v8 = vadd.f32 %v3067_v1, %v554_v60 }
 0x114   : > { %4526 = vst [vmem:[#allocation6_spill] sm:$0xff] %v3193_v61  ;;  %v2638_v10 = vpop.eup %2637  ;;  %2663 = vrcp.f32 %v718_v58  ;;  %v721_v11 = vadd.f32 1.0, %v2636_v4  ;;  %v2526_v13 = vpop.f32.mrf.mxu0  ;;  %v3207_v17 = vmul.f32 %v3137_v0, %v806_v3  ;;  %v3210_v19 = vmul.f32 %v3139_v2, %v806_v3 }
 0x115   : > { %v2640_v20 = vpop.eup %2639  ;;  %896 = vst [vmem:[#allocation2 + $0x39] sm:$0xff] %v3200_v6  ;;  %v807_v9 = vmul.f32 %v2638_v10, %v3082_v12  ;;  %2665 = vpow2.f32 %v2379_v5  ;;  %v2377_v23 = vmul.f32 -1.442695, %v3204_v8  ;;  %v3216_v25 = vadd.f32 %v2526_v13, %v3067_v1 }
 0x116   : > { %v2642_v30 = vpop.eup %2641  ;;  %2667 = vrcp.f32 %v721_v11  ;;  %v719_v31 = vadd.f32 1.0, %v2640_v20  ;;  %v567_v34 = vpop.f32.mrf.mxu0  ;;  %v3220_v35 = vmul.f32 %v3137_v0, %v3200_v6  ;;  %v3224_v36 = vmul.f32 %v3139_v2, %v3200_v6 }
 0x117   : > { %v2644_v37 = vpop.eup %2643  ;;  %894 = vst [vmem:[#allocation2 + $0x21] sm:$0xff] %v807_v9  ;;  %v3227_v12 = vmul.f32 %v2642_v30, %v3086_v15  ;;  %2669 = vpow2.f32 %v2377_v23  ;;  %v2382_v42 = vmul.f32 -1.442695, %v3216_v25  ;;  %v3231_v44 = vadd.f32 %v3067_v1, %v567_v34 }
 0x118   : > { %4527 = vst [vmem:[#allocation7_spill] sm:$0xff] %v3220_v35  ;;  %v2646_v47 = vpop.eup %2645  ;;  %2671 = vrcp.f32 %v719_v31  ;;  %v724_v49 = vadd.f32 1.0, %v2644_v37  ;;  %v2527_v50 = vpop.f32.mrf.mxu0  ;;  %v3233_v53 = vld [vmem:[#allocation2 + $0x30] sm:$0xff]  ;;  %v3236_v3 = vmul.f32 %v3137_v0, %v807_v9  ;;  %v3239_v54 = vmul.f32 %v3139_v2, %v807_v9 }
 0x119   : > { %4528 = vst [vmem:[#allocation8_spill] sm:$0xff] %v3227_v12  ;;  %v2648_v15 = vpop.eup %2647  ;;  %899 = vst [vmem:[#allocation2 + $0x61] sm:$0xff] %v3227_v12  ;;  %v3243_v57 = vmul.f32 %v2646_v47, %v3090_v18  ;;  %2673 = vpow2.f32 %v2382_v42  ;;  %v2380_v58 = vmul.f32 -1.442695, %v3231_v44  ;;  %v3247_v60 = vadd.f32 %v2527_v50, %v3067_v1 }
 0x11a   : > { %v2650_v4 = vpop.eup %2649  ;;  %2675 = vrcp.f32 %v724_v49  ;;  %v722_v5 = vadd.f32 1.0, %v2648_v15  ;;  %v570_v10 = vpop.f32.mrf.mxu0  ;;  %v930_v11 = vld [vmem:[#allocation2 + $0x18] sm:$0xff]  ;;  %v3251_v13 = vmul.f32 %v3126_v56, %v3233_v53  ;;  %v3255_v20 = vmul.f32 %v3135_v63, %v3233_v53 }
 0x11b   : > { %v2652_v18 = vpop.eup %2651  ;;  %897 = vst [vmem:[#allocation2 + $0x49] sm:$0xff] %v3243_v57  ;;  %v3259_v9 = vmul.f32 %v2650_v4, %v3094_v21  ;;  %2677 = vpow2.f32 %v2380_v58  ;;  %v2383_v23 = vmul.f32 -1.442695, %v3247_v60  ;;  %v3263_v30 = vadd.f32 %v3067_v1, %v570_v10 }
 0x11c   : > { %v2654_v31 = vpop.eup %2653  ;;  %2679 = vrcp.f32 %v722_v5  ;;  %v725_v34 = vadd.f32 1.0, %v2652_v18  ;;  %v2530_v37 = vpop.f32.mrf.mxu0  ;;  %v933_v42 = vld [vmem:[#allocation2 + $0x38] sm:$0xff]  ;;  %v3266_v47 = vmul.f32 %v3126_v56, %v930_v11  ;;  %v1004_v49 = vmul.f32 %v3135_v63, %v930_v11 }
 0x11d   : > { %4529 = vst [vmem:[#allocation9_spill] sm:$0xff] %v3259_v9  ;;  %v2656_v50 = vpop.eup %2655  ;;  %900 = vst [vmem:[#allocation2 + $0x69] sm:$0xff] %v3259_v9  ;;  %v3271_v21 = vmul.f32 %v2654_v31, %v3098_v24  ;;  %2681 = vpow2.f32 %v2383_v23  ;;  %v2381_v15 = vmul.f32 -1.442695, %v3263_v30  ;;  %v3275_v58 = vadd.f32 %v2530_v37, %v3067_v1 }
 0x11e   : > { %v2658_v4 = vpop.eup %2657  ;;  %2683 = vrcp.f32 %v725_v34  ;;  %v723_v5 = vadd.f32 1.0, %v2656_v50  ;;  %v583_v10 = vpop.f32.mrf.mxu0  ;;  %v931_v18 = vld [vmem:[#allocation2 + $0x20] sm:$0xff]  ;;  %v3278_v0 = vmul.f32 %v3126_v56, %v933_v42  ;;  %v3281_v11 = vmul.f32 %v3135_v63, %v933_v42 }
 0x11f   : > { %v2660_v35 = vpop.eup %2659  ;;  %898 = vst [vmem:[#allocation2 + $0x51] sm:$0xff] %v3271_v21  ;;  %v728_v24 = vadd.f32 1.0, %v2658_v4  ;;  %2685 = vpow2.f32 %v2381_v15  ;;  %v2386_v23 = vmul.f32 -1.442695, %v3275_v58  ;;  %v3286_v31 = vadd.f32 %v3067_v1, %v583_v10 }
 0x120   : > { %v2662_v34 = vpop.eup %2661  ;;  %v3289_v37 = vmul.f32 %v2660_v35, %v3102_v28  ;;  %2687 = vrcp.f32 %v723_v5  ;;  %v2531_v50 = vpop.f32.mrf.mxu0  ;;  %v3292_v9 = vmul.f32 %v3126_v56, %v931_v18  ;;  %v1005_v61 = vmul.f32 %v3135_v63, %v931_v18 }
 0x121   : > { %4530 = vst [vmem:[#allocation10_spill] sm:$0xff] %v3286_v31  ;;  %v2664_v12 = vpop.eup %2663  ;;  %2689 = vrcp.f32 %v728_v24  ;;  %v726_v4 = vadd.f32 1.0, %v2662_v34  ;;  %v2384_v15 = vmul.f32 -1.442695, %v3286_v31  ;;  %v3297_v2 = vadd.f32 %v2531_v50, %v3067_v1 }
 0x122   : > { %4531 = vst [vmem:[#allocation11_spill] sm:$0xff] %v3289_v37  ;;  %v2666_v10 = vpop.eup %2665  ;;  %903 = vst [vmem:[#allocation2 + $0x91] sm:$0xff] %v3289_v37  ;;  %v3301_v28 = vmul.f32 %v2664_v12, %v3106_v33  ;;  %2691 = vpow2.f32 %v2386_v23  ;;  %v586_v35 = vpop.f32.mrf.mxu0  ;;  %v1036_v5 = vadd.f32 %v1004_v49, %v3146_v14  ;;  %v1037_v18 = vadd.f32 %v1005_v61, %v3146_v14 }
 0x123   : > { %v2668_v56 = vpop.eup %2667  ;;  %2693 = vrcp.f32 %v726_v4  ;;  %v729_v24 = vadd.f32 1.0, %v2666_v10  ;;  %v2387_v34 = vmul.f32 -1.442695, %v3297_v2  ;;  %v3307_v50 = vadd.f32 %v3067_v1, %v586_v35 }
 0x124   : > { %v2670_v31 = vpop.eup %2669  ;;  %901 = vst [vmem:[#allocation2 + $0x79] sm:$0xff] %v3301_v28  ;;  %v3311_v33 = vmul.f32 %v2668_v56, %v3110_v39  ;;  %2695 = vpow2.f32 %v2384_v15  ;;  %v2534_v12 = vpop.f32.mrf.mxu0  ;;  %v1072_v49 = vmul.f32 %v3154_v26, %v3233_v53  ;;  %v1073_v14 = vmul.f32 %v3154_v26, %v933_v42 }
 0x125   : > { %v2672_v61 = vpop.eup %2671  ;;  %2697 = vrcp.f32 %v729_v24  ;;  %v727_v23 = vadd.f32 1.0, %v2670_v31  ;;  %v2385_v4 = vmul.f32 -1.442695, %v3307_v50  ;;  %v3318_v10 = vadd.f32 %v2534_v12, %v3067_v1 }
 0x126   : > { %4532 = vst [vmem:[#allocation12_spill] sm:$0xff] %v3311_v33  ;;  %v2674_v35 = vpop.eup %2673  ;;  %904 = vst [vmem:[#allocation2 + $0x99] sm:$0xff] %v3311_v33  ;;  %v3322_v39 = vmul.f32 %v2672_v61, %v3114_v45  ;;  %2699 = vpow2.f32 %v2387_v34  ;;  %v599_v56 = vpop.f32.mrf.mxu0  ;;  %v1104_v15 = vadd.f32 %v1072_v49, %v1036_v5  ;;  %v1105_v53 = vadd.f32 %v1073_v14, %v1037_v18 }
 0x127   : > { %v2676_v37 = vpop.eup %2675  ;;  %2701 = vrcp.f32 %v727_v23  ;;  %v732_v42 = vadd.f32 1.0, %v2674_v35  ;;  %v2390_v31 = vmul.f32 -1.442695, %v3318_v10  ;;  %v3326_v24 = vadd.f32 %v3067_v1, %v599_v56 }
 0x128   : > { %v2678_v12 = vpop.eup %2677  ;;  %902 = vst [vmem:[#allocation2 + $0x81] sm:$0xff] %v3322_v39  ;;  %v820_v33 = vmul.f32 %v2676_v37, %v3121_v52  ;;  %2703 = vpow2.f32 %v2385_v4  ;;  %v2535_v45 = vpop.f32.mrf.mxu0  ;;  %v1208_v34 = vadd.f32 %v3157_v27, %v1104_v15  ;;  %v1209_v5 = vadd.f32 %v3160_v29, %v1105_v53  ;;  %v1378_v29 = vld [vmem:[#allocation2 + $0x1a] sm:$0xff] }
 0x129   : > { %v2680_v18 = vpop.eup %2679  ;;  %2705 = vrcp.f32 %v732_v42  ;;  %v730_v49 = vadd.f32 1.0, %v2678_v12  ;;  %v2388_v14 = vmul.f32 -1.442695, %v3326_v24  ;;  %v3334_v61 = vadd.f32 %v2535_v45, %v3067_v1 }
 0x12a   : > { %v2682_v23 = vpop.eup %2681  ;;  %907 = vst [vmem:[#allocation2 + $0xc1] sm:$0xff] %v820_v33  ;;  %v3337_v35 = vmul.f32 %v2680_v18, %v3130_v59  ;;  %2707 = vpow2.f32 %v2390_v31  ;;  %v602_v52 = vpop.f32.mrf.mxu0  ;;  %v1276_v37 = vadd.f32 %v3210_v19, %v1208_v34  ;;  %v1277_v27 = vadd.f32 %v3239_v54, %v1209_v5  ;;  %v1379_v33 = vld [vmem:[#allocation2 + $0x22] sm:$0xff]  ;;  %v1380_v31 = vld [vmem:[#allocation2 + $0x32] sm:$0xff]  ;;  %v1381_v34 = vld [vmem:[#allocation2 + $0x3a] sm:$0xff] }
 0x12b   : > { %v2684_v4 = vpop.eup %2683  ;;  %2709 = vrcp.f32 %v730_v49  ;;  %v733_v56 = vadd.f32 1.0, %v2682_v23  ;;  %v2391_v15 = vmul.f32 -1.442695, %v3334_v61  ;;  %v3343_v53 = vadd.f32 %v3067_v1, %v602_v52 }
 0x12c   : > { %v2686_v42 = vpop.eup %2685  ;;  %905 = vst [vmem:[#allocation2 + $0xa9] sm:$0xff] %v3337_v35  ;;  %v821_v59 = vmul.f32 %v2684_v4, %v3143_v7  ;;  %2711 = vpow2.f32 %v2388_v14  ;;  %v1312_v19 = vmul.f32 %v3148_v16, %v3173_v43  ;;  %v1313_v54 = vmul.f32 %v3148_v16, %v3200_v6 }
 0x12d   : > { %v2688_v12 = vpop.eup %2687  ;;  %2713 = vrcp.f32 %v733_v56  ;;  %v731_v45 = vadd.f32 1.0, %v2686_v42  ;;  %v2389_v1 = vmul.f32 -1.442695, %v3343_v53  ;;  %v3353_v5 = vmul.f32 %v3166_v38, %v1378_v29 }
 0x12e   : > { %v2690_v18 = vpop.eup %2689  ;;  %908 = vst [vmem:[#allocation2 + $0xc9] sm:$0xff] %v821_v59  ;;  %v3356_v7 = vmul.f32 %v2688_v12, %v3152_v22  ;;  %2715 = vpow2.f32 %v2391_v15  ;;  %v1344_v43 = vadd.f32 %v1312_v19, %v1276_v37  ;;  %v1345_v49 = vadd.f32 %v1313_v54, %v1277_v27 }
 0x12f   : > { %v2692_v6 = vpop.eup %2691  ;;  %v824_v14 = vmul.f32 %v2690_v18, %v3164_v32  ;;  %2717 = vrcp.f32 %v731_v45  ;;  %v3360_v23 = vmul.f32 %v3166_v38, %v1379_v33  ;;  %v3363_v52 = vmul.f32 %v3166_v38, %v1380_v31 }
 0x130   : > { %v2694_v4 = vpop.eup %2693  ;;  %906 = vst [vmem:[#allocation2 + $0xb1] sm:$0xff] %v3356_v7  ;;  %v736_v56 = vadd.f32 1.0, %v2692_v6  ;;  %2719 = vpow2.f32 %v2389_v1  ;;  %v3367_v22 = vmul.f32 %v3166_v38, %v1381_v34  ;;  %v1448_v37 = vadd.f32 %v3180_v48, %v1344_v43  ;;  %v3380_v48 = vld [vmem:[#allocation2 + $0x48] sm:$0xff] }
 0x131   : > { %v2696_v27 = vpop.eup %2695  ;;  %911 = vst [vmem:[#allocation2 + $0xf1] sm:$0xff] %v824_v14  ;;  %v822_v32 = vmul.f32 %v2694_v4, %v3177_v46  ;;  %v1449_v15 = vadd.f32 %v3183_v51, %v1345_v49  ;;  %v1484_v42 = vmul.f32 %v3168_v40, %v1378_v29  ;;  %v1485_v59 = vmul.f32 %v3168_v40, %v1379_v33  ;;  %v3384_v33 = vld [vmem:[#allocation2 + $0x50] sm:$0xff]  ;;  %v3390_v14 = vld [vmem:[%s4502_s4] ss:$0 sm:$0xff] }
 0x132   : > { %v2698_v19 = vpop.eup %2697  ;;  %2721 = vrcp.f32 %v736_v56  ;;  %v734_v54 = vadd.f32 1.0, %v2696_v27  ;;  %v3375_v12 = vmul.f32 %v3168_v40, %v1380_v31  ;;  %v3378_v45 = vmul.f32 %v3168_v40, %v1381_v34 }
 0x133   : > { %v2700_v1 = vpop.eup %2699  ;;  %909 = vst [vmem:[#allocation2 + $0xd9] sm:$0xff] %v822_v32  ;;  %v825_v46 = vmul.f32 %v2698_v19, %v3189_v55  ;;  %v1516_v51 = vadd.f32 %v1484_v42, %v1448_v37  ;;  %v1517_v18 = vadd.f32 %v1485_v59, %v1449_v15  ;;  %v1552_v29 = vmul.f32 %v3170_v41, %v1380_v31 }
 0x134   : > { %v2702_v43 = vpop.eup %2701  ;;  %2723 = vrcp.f32 %v734_v54  ;;  %v737_v49 = vadd.f32 1.0, %v2700_v1  ;;  %v1553_v6 = vmul.f32 %v3170_v41, %v1381_v34  ;;  %v1038_v4 = vadd.f32 %v3255_v20, %v3266_v47 }
 0x135   : > { %v2704_v55 = vpop.eup %2703  ;;  %912 = vst [vmem:[#allocation2 + $0xf9] sm:$0xff] %v825_v46  ;;  %v823_v56 = vmul.f32 %v2702_v43, %v3204_v8  ;;  %v1584_v31 = vadd.f32 %v1552_v29, %v1516_v51  ;;  %v1039_v37 = vadd.f32 %v3281_v11, %v3292_v9  ;;  %v1074_v27 = vmul.f32 %v3154_v26, %v3380_v48  ;;  %v3410_v46 = vld [vmem:[#allocation2 + $0x4a] sm:$0xff] }
 0x136   : > { %v2706_v34 = vpop.eup %2705  ;;  %2725 = vrcp.f32 %v737_v49  ;;  %v735_v32 = vadd.f32 1.0, %v2704_v55  ;;  %v1585_v15 = vadd.f32 %v1553_v6, %v1517_v18  ;;  %v1075_v42 = vmul.f32 %v3154_v26, %v3384_v33  ;;  %v3417_v49 = vld [vmem:[#allocation2 + $0x52] sm:$0xff] }
 0x137   : > { %v2708_v59 = vpop.eup %2707  ;;  %910 = vst [vmem:[#allocation2 + $0xe1] sm:$0xff] %v823_v56  ;;  %v828_v20 = vmul.f32 %v2706_v34, %v3216_v25  ;;  %v3403_v8 = vadd.f32 %v3390_v14, %v1584_v31  ;;  %v1106_v47 = vadd.f32 %v1074_v27, %v1038_v4  ;;  %v1314_v9 = vmul.f32 %v3148_v16, %v3243_v57 }
 0x138   : > { %v2710_v11 = vpop.eup %2709  ;;  %2727 = vrcp.f32 %v735_v32  ;;  %v740_v19 = vadd.f32 1.0, %v2708_v59  ;;  %v3408_v54 = vadd.f32 %v3390_v14, %v1585_v15  ;;  %v1107_v1 = vadd.f32 %v1075_v42, %v1039_v37  ;;  %v3428_v42 = vld [vmem:[#allocation2 + $0x60] sm:$0xff] }
 0x139   : > { %v2712_v51 = vpop.eup %2711  ;;  %915 = vst [vmem:[#allocation2 + $0x121] sm:$0xff] %v828_v20  ;;  %v826_v25 = vmul.f32 %v2710_v11, %v3231_v44  ;;  %v2393_v18 = vmul.f32 -1.442695, %v3403_v8  ;;  %v1210_v29 = vadd.f32 %v3207_v17, %v1106_v47  ;;  %v1315_v43 = vmul.f32 %v3148_v16, %v3271_v21 }
 0x13a   : > { %v2714_v6 = vpop.eup %2713  ;;  %2729 = vrcp.f32 %v740_v19  ;;  %v738_v4 = vadd.f32 1.0, %v2712_v51  ;;  %v2394_v55 = vmul.f32 -1.442695, %v3408_v54  ;;  %v1211_v56 = vadd.f32 %v3236_v3, %v1107_v1  ;;  %v3430_v3 = vld [vmem:[#allocation2 + $0x68] sm:$0xff] }
 0x13b   : > { %v2716_v31 = vpop.eup %2715  ;;  %913 = vst [vmem:[#allocation2 + $0x109] sm:$0xff] %v826_v25  ;;  %v829_v44 = vmul.f32 %v2714_v6, %v3247_v60  ;;  %2731 = vpow2.f32 %v2393_v18  ;;  %v1278_v37 = vadd.f32 %v3197_v62, %v1210_v29  ;;  %v1554_v17 = vmul.f32 %v3170_v41, %v3410_v46 }
 0x13c   : > { %v2718_v27 = vpop.eup %2717  ;;  %2733 = vrcp.f32 %v738_v4  ;;  %v741_v34 = vadd.f32 1.0, %v2716_v31  ;;  %v1279_v32 = vadd.f32 %v3224_v36, %v1211_v56  ;;  %v1555_v15 = vmul.f32 %v3170_v41, %v3417_v49  ;;  %v4534_v56 = vld [vmem:[#allocation10_spill] sm:$0xff] }
 0x13d   : > { %v2720_v59 = vpop.eup %2719  ;;  %916 = vst [vmem:[#allocation2 + $0x129] sm:$0xff] %v829_v44  ;;  %v827_v60 = vmul.f32 %v2718_v27, %v3263_v30  ;;  %2735 = vpow2.f32 %v2394_v55  ;;  %v1346_v62 = vadd.f32 %v1314_v9, %v1278_v37  ;;  %v1008_v20 = vmul.f32 %v3135_v63, %v3380_v48  ;;  %v4535_v37 = vld [vmem:[#allocation8_spill] sm:$0xff]  ;;  %v3457_v27 = vld [vmem:[#allocation2 + $0x6a] sm:$0xff] }
 0x13e   : > { %2737 = vrcp.f32 %v741_v34  ;;  %v739_v47 = vadd.f32 1.0, %v2720_v59  ;;  %v1347_v11 = vadd.f32 %v1315_v43, %v1279_v32  ;;  %v1009_v36 = vmul.f32 %v3135_v63, %v3384_v33  ;;  %v4536_v32 = vld [vmem:[#allocation6_spill] sm:$0xff] }
 0x13f   : > { %v2722_v19 = vpop.eup %2721  ;;  %914 = vst [vmem:[#allocation2 + $0x111] sm:$0xff] %v827_v60  ;;  %v1450_v1 = vadd.f32 %v3353_v5, %v1346_v62  ;;  %v1040_v51 = vadd.f32 %v1008_v20, %v3251_v13  ;;  %v1076_v30 = vmul.f32 %v3154_v26, %v3428_v42  ;;  %v1077_v9 = vmul.f32 %v3154_v26, %v3430_v3  ;;  %v4533_v5 = vld [vmem:[#allocation5_spill] sm:$0xff] }
 0x140   : > { %v832_v25 = vmul.f32 %v2722_v19, %v3275_v58  ;;  %2739 = vrcp.f32 %v739_v47  ;;  %v1451_v18 = vadd.f32 %v3360_v23, %v1347_v11  ;;  %v1041_v29 = vadd.f32 %v1009_v36, %v3278_v0  ;;  %v3455_v0 = vld [vmem:[#allocation2 + $0x62] sm:$0xff]  ;;  %v4538_v11 = vld [vmem:[#allocation7_spill] sm:$0xff] }
 0x141   : > { %v2724_v43 = vpop.eup %2723  ;;  %v1518_v6 = vadd.f32 %v3375_v12, %v1450_v1  ;;  %v1108_v4 = vadd.f32 %v1076_v30, %v1040_v51  ;;  %v1248_v13 = vmul.f32 %v4533_v5, %v3243_v57  ;;  %v1249_v55 = vmul.f32 %v4533_v5, %v3271_v21  ;;  %v4537_v60 = vld [vmem:[#allocation9_spill] sm:$0xff] }
 0x142   : > { %919 = vst [vmem:[#allocation2 + $0x151] sm:$0xff] %v832_v25  ;;  %v830_v31 = vmul.f32 %v2724_v43, %v4534_v56  ;;  %v1519_v58 = vadd.f32 %v3378_v45, %v1451_v18  ;;  %v1109_v44 = vadd.f32 %v1077_v9, %v1041_v29  ;;  %v1316_v23 = vmul.f32 %v3148_v16, %v4535_v37  ;;  %v4539_v18 = vld [vmem:[#allocation3_spill] sm:$0xff] }
 0x143   : > { %v2726_v12 = vpop.eup %2725  ;;  %v1586_v34 = vadd.f32 %v1554_v17, %v1518_v6  ;;  %v1212_v59 = vadd.f32 %v4536_v32, %v1108_v4  ;;  %v1317_v62 = vmul.f32 %v3148_v16, %v4537_v60  ;;  %v1488_v20 = vmul.f32 %v3168_v40, %v3410_v46 }
 0x144   : > { %917 = vst [vmem:[#allocation2 + $0x139] sm:$0xff] %v830_v31  ;;  %v833_v45 = vmul.f32 %v2726_v12, %v3297_v2  ;;  %v1587_v47 = vadd.f32 %v1555_v15, %v1519_v58  ;;  %v1213_v36 = vadd.f32 %v4538_v11, %v1109_v44  ;;  %v1489_v19 = vmul.f32 %v3168_v40, %v3417_v49  ;;  %v3488_v44 = vld [vmem:[#allocation2 + $0x78] sm:$0xff] }
 0x145   : > { %v2728_v1 = vpop.eup %2727  ;;  %v3469_v17 = vadd.f32 %v3390_v14, %v1586_v34  ;;  %v1280_v51 = vadd.f32 %v1248_v13, %v1212_v59  ;;  %v1556_v30 = vmul.f32 %v3170_v41, %v3455_v0  ;;  %v1557_v9 = vmul.f32 %v3170_v41, %v3457_v27  ;;  %v3493_v34 = vld [vmem:[#allocation2 + $0x80] sm:$0xff] }
 0x146   : > { %920 = vst [vmem:[#allocation2 + $0x159] sm:$0xff] %v833_v45  ;;  %v831_v2 = vmul.f32 %v2728_v1, %v3307_v50  ;;  %v3477_v15 = vadd.f32 %v3390_v14, %v1587_v47  ;;  %v1281_v25 = vadd.f32 %v1249_v55, %v1213_v36  ;;  %v974_v29 = vmul.f32 %v4539_v18, %v3380_v48 }
 0x147   : > { %v2730_v43 = vpop.eup %2729  ;;  %v2395_v6 = vmul.f32 -1.442695, %v3469_v17  ;;  %v1348_v4 = vadd.f32 %v1316_v23, %v1280_v51  ;;  %v975_v13 = vmul.f32 %v4539_v18, %v3384_v33  ;;  %v1010_v56 = vmul.f32 %v3135_v63, %v3428_v42 }
 0x148   : > { %v2732_v31 = vpop.eup %2731  ;;  %918 = vst [vmem:[#allocation2 + $0x141] sm:$0xff] %v831_v2  ;;  %v836_v50 = vmul.f32 %v2730_v43, %v3318_v10  ;;  %v2396_v58 = vmul.f32 -1.442695, %v3477_v15  ;;  %v1349_v55 = vadd.f32 %v1317_v62, %v1281_v25  ;;  %v1011_v48 = vmul.f32 %v3135_v63, %v3430_v3 }
 0x149   : > { %v2734_v12 = vpop.eup %2733  ;;  %v1751_v23 = vadd.f32 1.0, %v2732_v31  ;;  %2741 = vpow2.f32 %v2395_v6  ;;  %v1452_v33 = vadd.f32 %v3363_v52, %v1348_v4  ;;  %v1042_v32 = vadd.f32 %v1010_v56, %v974_v29  ;;  %v3516_v31 = vld [vmem:[#allocation2 + $0x7a] sm:$0xff] }
 0x14a   : > { %v2736_v59 = vpop.eup %2735  ;;  %923 = vst [vmem:[#allocation2 + $0x181] sm:$0xff] %v836_v50  ;;  %v834_v10 = vmul.f32 %v2734_v12, %v3326_v24  ;;  %2743 = vpow2.f32 %v2396_v58  ;;  %v1453_v62 = vadd.f32 %v3367_v22, %v1349_v55  ;;  %v1043_v45 = vadd.f32 %v1011_v48, %v975_v13  ;;  %v4540_v24 = vld [vmem:[#allocation4_spill] sm:$0xff]  ;;  %v3523_v50 = vld [vmem:[#allocation2 + $0x82] sm:$0xff] }
 0x14b   : > { %v2738_v47 = vpop.eup %2737  ;;  %v1752_v11 = vadd.f32 1.0, %v2736_v59  ;;  %2745 = vrcp.f32 %v1751_v23  ;;  %v1520_v36 = vadd.f32 %v1488_v20, %v1452_v33  ;;  %v1078_v1 = vmul.f32 %v3154_v26, %v3488_v44 }
 0x14c   : > { %921 = vst [vmem:[#allocation2 + $0x169] sm:$0xff] %v834_v10  ;;  %v837_v52 = vmul.f32 %v2738_v47, %v3334_v61  ;;  %v1521_v51 = vadd.f32 %v1489_v19, %v1453_v62  ;;  %v1079_v2 = vmul.f32 %v3154_v26, %v3493_v34  ;;  %v1182_v25 = vmul.f32 %v4540_v24, %v3243_v57  ;;  %v3537_v62 = vld [vmem:[#allocation2 + $0x90] sm:$0xff] }
 0x14d   : > { %v2740_v29 = vpop.eup %2739  ;;  %2747 = vrcp.f32 %v1752_v11  ;;  %v1588_v22 = vadd.f32 %v1556_v30, %v1520_v36  ;;  %v1110_v43 = vadd.f32 %v1078_v1, %v1042_v32  ;;  %v1183_v20 = vmul.f32 %v4540_v24, %v3271_v21 }
 0x14e   : > { %924 = vst [vmem:[#allocation2 + $0x189] sm:$0xff] %v837_v52  ;;  %v835_v6 = vmul.f32 %v2740_v29, %v3343_v53  ;;  %v1589_v4 = vadd.f32 %v1557_v9, %v1521_v51  ;;  %v1111_v13 = vadd.f32 %v1079_v2, %v1043_v45  ;;  %v1250_v61 = vmul.f32 %v4533_v5, %v4535_v37 }
 0x14f   : > { %v3510_v19 = vadd.f32 %v3390_v14, %v1588_v22  ;;  %v1214_v56 = vadd.f32 %v1182_v25, %v1110_v43  ;;  %v1251_v57 = vmul.f32 %v4533_v5, %v4537_v60  ;;  %v1318_v30 = vmul.f32 %v3148_v16, %v3301_v28 }
 0x150   : > { %922 = vst [vmem:[#allocation2 + $0x171] sm:$0xff] %v835_v6  ;;  %v3519_v21 = vadd.f32 %v3390_v14, %v1589_v4  ;;  %v1215_v53 = vadd.f32 %v1183_v20, %v1111_v13  ;;  %v1319_v9 = vmul.f32 %v3148_v16, %v3322_v39  ;;  %v1422_v58 = vmul.f32 %v3166_v38, %v3410_v46  ;;  %v3539_v46 = vld [vmem:[#allocation2 + $0x98] sm:$0xff] }
 0x151   : > { %v2397_v55 = vmul.f32 -1.442695, %v3510_v19  ;;  %v1282_v48 = vadd.f32 %v1250_v61, %v1214_v56  ;;  %v1423_v12 = vmul.f32 %v3166_v38, %v3417_v49  ;;  %v1490_v23 = vmul.f32 %v3168_v40, %v3455_v0 }
 0x152   : > { %v2398_v33 = vmul.f32 -1.442695, %v3519_v21  ;;  %v1283_v32 = vadd.f32 %v1251_v57, %v1215_v53  ;;  %v1491_v59 = vmul.f32 %v3168_v40, %v3457_v27  ;;  %v1558_v10 = vmul.f32 %v3170_v41, %v3516_v31 }
 0x153   : > { %2749 = vpow2.f32 %v2397_v55  ;;  %v1350_v45 = vadd.f32 %v1318_v30, %v1282_v48  ;;  %v1559_v49 = vmul.f32 %v3170_v41, %v3523_v50  ;;  %v976_v47 = vmul.f32 %v4539_v18, %v3428_v42 }
 0x154   : > { %2751 = vpow2.f32 %v2398_v33  ;;  %v1351_v11 = vadd.f32 %v1319_v9, %v1283_v32  ;;  %v977_v36 = vmul.f32 %v4539_v18, %v3430_v3  ;;  %v1012_v1 = vmul.f32 %v3135_v63, %v3488_v44 }
 0x155   : > { %v1454_v52 = vadd.f32 %v1422_v58, %v1350_v45  ;;  %v1013_v51 = vmul.f32 %v3135_v63, %v3493_v34  ;;  %v1080_v2 = vmul.f32 %v3154_v26, %v3537_v62  ;;  %v1081_v25 = vmul.f32 %v3154_v26, %v3539_v46 }
 0x156   : > { %v2742_v29 = vpop.eup %2741  ;;  %v1455_v42 = vadd.f32 %v1423_v12, %v1351_v11  ;;  %v1044_v22 = vadd.f32 %v1012_v1, %v976_v47  ;;  %v1184_v43 = vmul.f32 %v4540_v24, %v4535_v37  ;;  %v1185_v3 = vmul.f32 %v4540_v24, %v4537_v60  ;;  %v4542_v47 = vld [vmem:[#allocation12_spill] sm:$0xff] }
 0x157   : > { %v2744_v20 = vpop.eup %2743  ;;  %v1753_v6 = vadd.f32 1.0, %v2742_v29  ;;  %v1522_v4 = vadd.f32 %v1490_v23, %v1454_v52  ;;  %v1045_v13 = vadd.f32 %v1013_v51, %v977_v36  ;;  %v1252_v61 = vmul.f32 %v4533_v5, %v3301_v28  ;;  %v4541_v23 = vld [vmem:[#allocation11_spill] sm:$0xff] }
 0x158   : > { %v2746_v56 = vpop.eup %2745  ;;  %v1754_v57 = vadd.f32 1.0, %v2744_v20  ;;  %v1523_v30 = vadd.f32 %v1491_v59, %v1455_v42  ;;  %v1112_v53 = vadd.f32 %v1080_v2, %v1044_v22  ;;  %v1253_v9 = vmul.f32 %v4533_v5, %v3322_v39  ;;  %v3595_v20 = vld [vmem:[#allocation2 + $0xb0] sm:$0xff] }
 0x159   : > { %v1847_v58 = vmul.f32 %v2746_v56, %v3403_v8  ;;  %2753 = vrcp.f32 %v1753_v6  ;;  %v1590_v37 = vadd.f32 %v1558_v10, %v1522_v4  ;;  %v1113_v55 = vadd.f32 %v1081_v25, %v1045_v13  ;;  %v3572_v8 = vld [vmem:[#allocation2 + $0x92] sm:$0xff] }
 0x15a   : > { %v2748_v60 = vpop.eup %2747  ;;  %2755 = vrcp.f32 %v1754_v57  ;;  %v1591_v48 = vadd.f32 %v1559_v49, %v1523_v30  ;;  %v1216_v12 = vadd.f32 %v1184_v43, %v1112_v53  ;;  %v1320_v33 = vmul.f32 %v3148_v16, %v4541_v23  ;;  %v3577_v49 = vld [vmem:[#allocation2 + $0x9a] sm:$0xff] }
 0x15b   : > { %v1848_v32 = vmul.f32 %v2748_v60, %v3408_v54  ;;  %v3568_v59 = vadd.f32 %v3390_v14, %v1590_v37  ;;  %v1217_v45 = vadd.f32 %v1185_v3, %v1113_v55  ;;  %v1321_v11 = vmul.f32 %v3148_v16, %v4542_v47 }
 0x15c   : > { %v3575_v10 = vadd.f32 %v3390_v14, %v1591_v48  ;;  %v1284_v36 = vadd.f32 %v1252_v61, %v1216_v12  ;;  %v1424_v1 = vmul.f32 %v3166_v38, %v3455_v0  ;;  %v1425_v54 = vmul.f32 %v3166_v38, %v3457_v27  ;;  %v3591_v0 = vld [vmem:[#allocation2 + $0xa8] sm:$0xff] }
 0x15d   : > { %v1879_v52 = vpack.c.bf16 %v1848_v32, %v1847_v58  ;;  %v2399_v51 = vmul.f32 -1.442695, %v3568_v59  ;;  %v1285_v2 = vadd.f32 %v1253_v9, %v1217_v45  ;;  %v1492_v25 = vmul.f32 %v3168_v40, %v3516_v31 }
 0x15e   : > { %v2400_v29 = vmul.f32 -1.442695, %v3575_v10  ;;  %v1352_v42 = vadd.f32 %v1320_v33, %v1284_v36  ;;  %v1493_v22 = vmul.f32 %v3168_v40, %v3523_v50  ;;  %v1560_v43 = vmul.f32 %v3170_v41, %v3572_v8 }
 0x15f   : > { %2552 = vmatprep.mubr.bf16.mxu1 %v1879_v52  ;;  %2757 = vpow2.f32 %v2399_v51  ;;  %v1353_v27 = vadd.f32 %v1321_v11, %v1285_v2  ;;  %v1561_v3 = vmul.f32 %v3170_v41, %v3577_v49  ;;  %v978_v6 = vmul.f32 %v4539_v18, %v3488_v44 }
 0x160   : > { %v2750_v4 = vpop.eup %2749  ;;  %2759 = vpow2.f32 %v2400_v29  ;;  %v1456_v13 = vadd.f32 %v1424_v1, %v1352_v42  ;;  %v979_v61 = vmul.f32 %v4539_v18, %v3493_v34  ;;  %v1014_v56 = vmul.f32 %v3135_v63, %v3537_v62 }
 0x161   : > { %v2752_v57 = vpop.eup %2751  ;;  %v1755_v30 = vadd.f32 1.0, %v2750_v4  ;;  %v1457_v53 = vadd.f32 %v1425_v54, %v1353_v27  ;;  %v1015_v9 = vmul.f32 %v3135_v63, %v3539_v46  ;;  %v1082_v58 = vmul.f32 %v3154_v26, %v3591_v0 }
 0x162   : > { %v1756_v37 = vadd.f32 1.0, %v2752_v57  ;;  %v1524_v44 = vadd.f32 %v1492_v25, %v1456_v13  ;;  %v1046_v55 = vadd.f32 %v1014_v56, %v978_v6  ;;  %v1083_v60 = vmul.f32 %v3154_v26, %v3595_v20  ;;  %v3634_v13 = vld [vmem:[#allocation2 + $0xb2] sm:$0xff] }
 0x163   : > { %2761 = vrcp.f32 %v1755_v30  ;;  %v1525_v34 = vadd.f32 %v1493_v22, %v1457_v53  ;;  %v1047_v48 = vadd.f32 %v1015_v9, %v979_v61  ;;  %v1186_v12 = vmul.f32 %v4540_v24, %v3301_v28  ;;  %v3645_v9 = vld [vmem:[#allocation2 + $0xc0] sm:$0xff] }
 0x164   : > { %2763 = vrcp.f32 %v1756_v37  ;;  %v1592_v33 = vadd.f32 %v1560_v43, %v1524_v44  ;;  %v1114_v32 = vadd.f32 %v1082_v58, %v1046_v55  ;;  %v1187_v45 = vmul.f32 %v4540_v24, %v3322_v39  ;;  %v3628_v43 = vld [vmem:[#allocation2 + $0xaa] sm:$0xff] }
 0x165   : > { %v1593_v11 = vadd.f32 %v1561_v3, %v1525_v34  ;;  %v1115_v36 = vadd.f32 %v1083_v60, %v1047_v48  ;;  %v1254_v1 = vmul.f32 %v4533_v5, %v4541_v23  ;;  %v1255_v54 = vmul.f32 %v4533_v5, %v4542_v47  ;;  %v3647_v58 = vld [vmem:[#allocation2 + $0xc8] sm:$0xff] }
 0x166   : > { %v2754_v52 = vpop.eup %2753  ;;  %v3618_v51 = vadd.f32 %v3390_v14, %v1592_v33  ;;  %v1218_v2 = vadd.f32 %v1186_v12, %v1114_v32  ;;  %v1322_v28 = vmul.f32 %v3148_v16, %v3337_v35  ;;  %v1323_v25 = vmul.f32 %v3148_v16, %v3356_v7 }
 0x167   : > { %v2756_v39 = vpop.eup %2755  ;;  %v1849_v29 = vmul.f32 %v2754_v52, %v3469_v17  ;;  %v3626_v42 = vadd.f32 %v3390_v14, %v1593_v11  ;;  %v1219_v22 = vadd.f32 %v1187_v45, %v1115_v36  ;;  %v1426_v27 = vmul.f32 %v3166_v38, %v3516_v31 }
 0x168   : > { %v1850_v3 = vmul.f32 %v2756_v39, %v3477_v15  ;;  %v2401_v6 = vmul.f32 -1.442695, %v3618_v51  ;;  %v1286_v4 = vadd.f32 %v1254_v1, %v1218_v2  ;;  %v1427_v61 = vmul.f32 %v3166_v38, %v3523_v50 }
 0x169   : > { %v2402_v17 = vmul.f32 -1.442695, %v3626_v42  ;;  %v1287_v56 = vadd.f32 %v1255_v54, %v1219_v22  ;;  %v1494_v57 = vmul.f32 %v3168_v40, %v3572_v8  ;;  %v1495_v30 = vmul.f32 %v3168_v40, %v3577_v49 }
 0x16a   : > { %v1880_v31 = vpack.c.bf16 %v1850_v3, %v1849_v29  ;;  %2765 = vpow2.f32 %v2401_v6  ;;  %v1354_v15 = vadd.f32 %v1322_v28, %v1286_v4  ;;  %v1562_v53 = vmul.f32 %v3170_v41, %v3628_v43  ;;  %v3669_v3 = vld [vmem:[#allocation2 + $0xc9] sm:$0xff] }
 0x16b   : > { %2767 = vpow2.f32 %v2402_v17  ;;  %v1355_v50 = vadd.f32 %v1323_v25, %v1287_v56  ;;  %v1563_v37 = vmul.f32 %v3170_v41, %v3634_v13  ;;  %v980_v44 = vmul.f32 %v4539_v18, %v3537_v62 }
 0x16c   : > { %v2758_v55 = vpop.eup %2757  ;;  %2553 = vmatmul.mubr.bf16.vlgmr.msra.gmra.mxu1 %v1880_v31  ;;  %v1458_v60 = vadd.f32 %v1426_v27, %v1354_v15  ;;  %v981_v34 = vmul.f32 %v4539_v18, %v3539_v46  ;;  %v1016_v48 = vmul.f32 %v3135_v63, %v3591_v0  ;;  %v1017_v12 = vmul.f32 %v3135_v63, %v3595_v20  ;;  %v3667_v27 = vld [vmem:[#allocation2 + $0xc1] sm:$0xff] }
 0x16d   : > { %v2760_v33 = vpop.eup %2759  ;;  %v1757_v32 = vadd.f32 1.0, %v2758_v55  ;;  %v1459_v45 = vadd.f32 %v1427_v61, %v1355_v50  ;;  %v1084_v11 = vmul.f32 %v3154_v26, %v3645_v9  ;;  %v1085_v62 = vmul.f32 %v3154_v26, %v3647_v58 }
 0x16e   : > { %v1758_v36 = vadd.f32 1.0, %v2760_v33  ;;  %v1526_v1 = vadd.f32 %v1494_v57, %v1458_v60  ;;  %v1048_v54 = vadd.f32 %v1016_v48, %v980_v44  ;;  %v1049_v52 = vadd.f32 %v1017_v12, %v981_v34  ;;  %v3692_v60 = vld [vmem:[#allocation2 + $0xca] sm:$0xff] }
 0x16f   : > { %2769 = vrcp.f32 %v1757_v32  ;;  %v1527_v46 = vadd.f32 %v1495_v30, %v1459_v45  ;;  %v1188_v2 = vmul.f32 %v4540_v24, %v4541_v23  ;;  %v1189_v28 = vmul.f32 %v4540_v24, %v4542_v47 }
 0x170   : > { %v2762_v25 = vpop.eup %2761  ;;  %2771 = vrcp.f32 %v1758_v36  ;;  %v1594_v39 = vadd.f32 %v1562_v53, %v1526_v1  ;;  %v1116_v29 = vadd.f32 %v1084_v11, %v1048_v54  ;;  %v1117_v22 = vadd.f32 %v1085_v62, %v1049_v52  ;;  %v3687_v53 = vld [vmem:[#allocation2 + $0xc2] sm:$0xff]  ;;  %v3703_v11 = vld [vmem:[#allocation2 + $0xd8] sm:$0xff] }
 0x171   : > { %v2764_v6 = vpop.eup %2763  ;;  %v1851_v4 = vmul.f32 %v2762_v25, %v3510_v19  ;;  %v1595_v61 = vadd.f32 %v1563_v37, %v1527_v46  ;;  %v1256_v17 = vmul.f32 %v4533_v5, %v3337_v35  ;;  %v1257_v23 = vmul.f32 %v4533_v5, %v3356_v7  ;;  %v3705_v62 = vld [vmem:[#allocation2 + $0xe0] sm:$0xff] }
 0x172   : > { %v1852_v47 = vmul.f32 %v2764_v6, %v3519_v21  ;;  %v3678_v56 = vadd.f32 %v3390_v14, %v1594_v39  ;;  %v1220_v57 = vadd.f32 %v1188_v2, %v1116_v29  ;;  %v1221_v30 = vadd.f32 %v1189_v28, %v1117_v22 }
 0x173   : > { %v3681_v31 = vadd.f32 %v3390_v14, %v1595_v61  ;;  %v1324_v19 = vmul.f32 %v3148_v16, %v3667_v27  ;;  %v1325_v15 = vmul.f32 %v3148_v16, %v3669_v3  ;;  %v1428_v50 = vmul.f32 %v3166_v38, %v3572_v8  ;;  %v3721_v61 = vld [vmem:[#allocation2 + $0xd9] sm:$0xff] }
 0x174   : > { %v1881_v21 = vpack.c.bf16 %v1852_v47, %v1851_v4  ;;  %v2403_v37 = vmul.f32 -1.442695, %v3678_v56  ;;  %v1288_v44 = vadd.f32 %v1256_v17, %v1220_v57  ;;  %v1289_v55 = vadd.f32 %v1257_v23, %v1221_v30 }
 0x175   : > { %v2404_v34 = vmul.f32 -1.442695, %v3681_v31  ;;  %v1429_v48 = vmul.f32 %v3166_v38, %v3577_v49  ;;  %v1496_v12 = vmul.f32 %v3168_v40, %v3628_v43  ;;  %v1497_v33 = vmul.f32 %v3168_v40, %v3634_v13 }
 0x176   : > { %2556 = vmatprep.mubr.bf16.mxu1 %v1881_v21  ;;  %2773 = vpow2.f32 %v2403_v37  ;;  %v1356_v8 = vadd.f32 %v1324_v19, %v1288_v44  ;;  %v1357_v32 = vadd.f32 %v1325_v15, %v1289_v55  ;;  %v1564_v45 = vmul.f32 %v3170_v41, %v3687_v53 }
 0x177   : > { %v2766_v36 = vpop.eup %2765  ;;  %2775 = vpow2.f32 %v2404_v34  ;;  %v1565_v49 = vmul.f32 %v3170_v41, %v3692_v60  ;;  %v982_v1 = vmul.f32 %v4539_v18, %v3591_v0  ;;  %v983_v54 = vmul.f32 %v4539_v18, %v3595_v20 }
 0x178   : > { %v2768_v52 = vpop.eup %2767  ;;  %v1759_v46 = vadd.f32 1.0, %v2766_v36  ;;  %v1460_v2 = vadd.f32 %v1428_v50, %v1356_v8  ;;  %v1461_v28 = vadd.f32 %v1429_v48, %v1357_v32  ;;  %v1018_v25 = vmul.f32 %v3135_v63, %v3645_v9  ;;  %v3727_v50 = vld [vmem:[#allocation2 + $0xe1] sm:$0xff] }
 0x179   : > { %v1760_v39 = vadd.f32 1.0, %v2768_v52  ;;  %v1019_v29 = vmul.f32 %v3135_v63, %v3647_v58  ;;  %v1086_v22 = vmul.f32 %v3154_v26, %v3703_v11  ;;  %v1087_v0 = vmul.f32 %v3154_v26, %v3705_v62  ;;  %v3743_v8 = vld [vmem:[#allocation2 + $0xda] sm:$0xff] }
 0x17a   : > { %2777 = vrcp.f32 %v1759_v46  ;;  %v1528_v6 = vadd.f32 %v1496_v12, %v1460_v2  ;;  %v1529_v20 = vadd.f32 %v1497_v33, %v1461_v28  ;;  %v1050_v4 = vadd.f32 %v1018_v25, %v982_v1 }
 0x17b   : > { %2779 = vrcp.f32 %v1760_v39  ;;  %v1051_v17 = vadd.f32 %v1019_v29, %v983_v54  ;;  %v1190_v23 = vmul.f32 %v4540_v24, %v3337_v35  ;;  %v1191_v47 = vmul.f32 %v4540_v24, %v3356_v7  ;;  %v3765_v29 = vld [vmem:[#allocation2 + $0xf8] sm:$0xff] }
 0x17c   : > { %v2770_v57 = vpop.eup %2769  ;;  %v1596_v30 = vadd.f32 %v1564_v45, %v1528_v6  ;;  %v1597_v19 = vadd.f32 %v1565_v49, %v1529_v20  ;;  %v1118_v15 = vadd.f32 %v1086_v22, %v1050_v4  ;;  %v1258_v21 = vmul.f32 %v4533_v5, %v3667_v27  ;;  %v3747_v45 = vld [vmem:[#allocation2 + $0xe2] sm:$0xff] }
 0x17d   : > { %v2772_v37 = vpop.eup %2771  ;;  %v1853_v44 = vmul.f32 %v2770_v57, %v3568_v59  ;;  %v1119_v55 = vadd.f32 %v1087_v0, %v1051_v17  ;;  %v1259_v34 = vmul.f32 %v4533_v5, %v3669_v3  ;;  %v1326_v35 = vmul.f32 %v3148_v16, %v3721_v61 }
 0x17e   : > { %v1854_v7 = vmul.f32 %v2772_v37, %v3575_v10  ;;  %v3738_v48 = vadd.f32 %v3390_v14, %v1596_v30  ;;  %v3741_v12 = vadd.f32 %v3390_v14, %v1597_v19  ;;  %v1222_v33 = vadd.f32 %v1190_v23, %v1118_v15 }
 0x17f   : > { %v1223_v32 = vadd.f32 %v1191_v47, %v1119_v55  ;;  %v1327_v59 = vmul.f32 %v3148_v16, %v3727_v50  ;;  %v1430_v36 = vmul.f32 %v3166_v38, %v3628_v43  ;;  %v1431_v10 = vmul.f32 %v3166_v38, %v3634_v13  ;;  %v3761_v43 = vld [vmem:[#allocation2 + $0xf0] sm:$0xff] }
 0x180   : > { %v1882_v49 = vpack.c.bf16 %v1854_v7, %v1853_v44  ;;  %v2405_v1 = vmul.f32 -1.442695, %v3738_v48  ;;  %v2406_v54 = vmul.f32 -1.442695, %v3741_v12  ;;  %v1290_v52 = vadd.f32 %v1258_v21, %v1222_v33  ;;  %v3781_v7 = vld [vmem:[#allocation2 + $0xf1] sm:$0xff]  ;;  %v3783_v33 = vld [vmem:[#allocation2 + $0xf9] sm:$0xff] }
 0x181   : > { %v1291_v46 = vadd.f32 %v1259_v34, %v1223_v32  ;;  %v1498_v2 = vmul.f32 %v3168_v40, %v3687_v53  ;;  %v1499_v28 = vmul.f32 %v3168_v40, %v3692_v60  ;;  %v1566_v25 = vmul.f32 %v3170_v41, %v3743_v8 }
 0x182   : > { %2557 = vmatmul.mubr.bf16.gmra.mxu1 %v1882_v49  ;;  %2781 = vpow2.f32 %v2405_v1  ;;  %v1358_v13 = vadd.f32 %v1326_v35, %v1290_v52  ;;  %v1567_v39 = vmul.f32 %v3170_v41, %v3747_v45  ;;  %v984_v22 = vmul.f32 %v4539_v18, %v3645_v9 }
 0x183   : > { %v2774_v0 = vpop.eup %2773  ;;  %2783 = vpow2.f32 %v2406_v54  ;;  %v1359_v6 = vadd.f32 %v1327_v59, %v1291_v46  ;;  %v985_v20 = vmul.f32 %v4539_v18, %v3647_v58  ;;  %v1020_v4 = vmul.f32 %v3135_v63, %v3703_v11 }
 0x184   : > { %v2776_v17 = vpop.eup %2775  ;;  %v1761_v23 = vadd.f32 1.0, %v2774_v0  ;;  %v1462_v47 = vadd.f32 %v1430_v36, %v1358_v13  ;;  %v1021_v57 = vmul.f32 %v3135_v63, %v3705_v62  ;;  %v1088_v30 = vmul.f32 %v3154_v26, %v3761_v43 }
 0x185   : > { %v1762_v19 = vadd.f32 1.0, %v2776_v17  ;;  %v1463_v9 = vadd.f32 %v1431_v10, %v1359_v6  ;;  %v1052_v15 = vadd.f32 %v1020_v4, %v984_v22  ;;  %v1089_v21 = vmul.f32 %v3154_v26, %v3765_v29  ;;  %v3805_v22 = vld [vmem:[#allocation2 + $0xfa] sm:$0xff] }
 0x186   : > { %2785 = vrcp.f32 %v1761_v23  ;;  %v1530_v58 = vadd.f32 %v1498_v2, %v1462_v47  ;;  %v1053_v37 = vadd.f32 %v1021_v57, %v985_v20  ;;  %v1192_v44 = vmul.f32 %v4540_v24, %v3667_v27 }
 0x187   : > { %v2778_v55 = vpop.eup %2777  ;;  %2787 = vrcp.f32 %v1762_v19  ;;  %v1531_v34 = vadd.f32 %v1499_v28, %v1463_v9  ;;  %v1120_v35 = vadd.f32 %v1088_v30, %v1052_v15  ;;  %v1193_v32 = vmul.f32 %v4540_v24, %v3669_v3  ;;  %v3823_v9 = vld [vmem:[#allocation2 + $0x110] sm:$0xff] }
 0x188   : > { %v2780_v59 = vpop.eup %2779  ;;  %v1855_v36 = vmul.f32 %v2778_v55, %v3618_v51  ;;  %v1598_v10 = vadd.f32 %v1566_v25, %v1530_v58  ;;  %v1121_v49 = vadd.f32 %v1089_v21, %v1053_v37  ;;  %v1260_v1 = vmul.f32 %v4533_v5, %v3721_v61  ;;  %v3800_v25 = vld [vmem:[#allocation2 + $0xf2] sm:$0xff] }
 0x189   : > { %v1856_v27 = vmul.f32 %v2780_v59, %v3626_v42  ;;  %v1599_v54 = vadd.f32 %v1567_v39, %v1531_v34  ;;  %v1224_v52 = vadd.f32 %v1192_v44, %v1120_v35  ;;  %v1261_v46 = vmul.f32 %v4533_v5, %v3727_v50 }
 0x18a   : > { %v3794_v2 = vadd.f32 %v3390_v14, %v1598_v10  ;;  %v1225_v28 = vadd.f32 %v1193_v32, %v1121_v49  ;;  %v1328_v3 = vmul.f32 %v3148_v16, %v3781_v7  ;;  %v1329_v51 = vmul.f32 %v3148_v16, %v3783_v33 }
 0x18b   : > { %v1883_v13 = vpack.c.bf16 %v1856_v27, %v1855_v36  ;;  %v3803_v42 = vadd.f32 %v3390_v14, %v1599_v54  ;;  %v1292_v39 = vadd.f32 %v1260_v1, %v1224_v52  ;;  %v1432_v0 = vmul.f32 %v3166_v38, %v3687_v53  ;;  %v3819_v53 = vld [vmem:[#allocation2 + $0x108] sm:$0xff] }
 0x18c   : > { %v2407_v6 = vmul.f32 -1.442695, %v3794_v2  ;;  %v1293_v20 = vadd.f32 %v1261_v46, %v1225_v28  ;;  %v1433_v4 = vmul.f32 %v3166_v38, %v3692_v60  ;;  %v1500_v17 = vmul.f32 %v3168_v40, %v3743_v8  ;;  %v3839_v28 = vld [vmem:[#allocation2 + $0x109] sm:$0xff] }
 0x18d   : > { %2560 = vmatprep.mubr.bf16.mxu1 %v1883_v13  ;;  %v2408_v23 = vmul.f32 -1.442695, %v3803_v42  ;;  %v1360_v47 = vadd.f32 %v1328_v3, %v1292_v39  ;;  %v1501_v57 = vmul.f32 %v3168_v40, %v3747_v45  ;;  %v1568_v30 = vmul.f32 %v3170_v41, %v3800_v25  ;;  %v3841_v3 = vld [vmem:[#allocation2 + $0x111] sm:$0xff] }
 0x18e   : > { %2789 = vpow2.f32 %v2407_v6  ;;  %v1361_v19 = vadd.f32 %v1329_v51, %v1293_v20  ;;  %v1569_v60 = vmul.f32 %v3170_v41, %v3805_v22  ;;  %v986_v15 = vmul.f32 %v4539_v18, %v3703_v11 }
 0x18f   : > { %v2782_v21 = vpop.eup %2781  ;;  %2791 = vpow2.f32 %v2408_v23  ;;  %v1464_v58 = vadd.f32 %v1432_v0, %v1360_v47  ;;  %v987_v37 = vmul.f32 %v4539_v18, %v3705_v62  ;;  %v1022_v44 = vmul.f32 %v3135_v63, %v3761_v43 }
 0x190   : > { %v2784_v55 = vpop.eup %2783  ;;  %v1763_v34 = vadd.f32 1.0, %v2782_v21  ;;  %v1465_v35 = vadd.f32 %v1433_v4, %v1361_v19  ;;  %v1023_v32 = vmul.f32 %v3135_v63, %v3765_v29  ;;  %v1090_v59 = vmul.f32 %v3154_v26, %v3819_v53 }
 0x191   : > { %v1764_v36 = vadd.f32 1.0, %v2784_v55  ;;  %v1532_v11 = vadd.f32 %v1500_v17, %v1464_v58  ;;  %v1054_v10 = vadd.f32 %v1022_v44, %v986_v15  ;;  %v1091_v49 = vmul.f32 %v3154_v26, %v3823_v9  ;;  %v3864_v15 = vld [vmem:[#allocation2 + $0x112] sm:$0xff] }
 0x192   : > { %2793 = vrcp.f32 %v1763_v34  ;;  %v1533_v62 = vadd.f32 %v1501_v57, %v1465_v35  ;;  %v1055_v1 = vadd.f32 %v1023_v32, %v987_v37  ;;  %v1194_v27 = vmul.f32 %v4540_v24, %v3721_v61  ;;  %v3877_v32 = vld [vmem:[#allocation2 + $0x120] sm:$0xff] }
 0x193   : > { %v2786_v54 = vpop.eup %2785  ;;  %2795 = vrcp.f32 %v1764_v36  ;;  %v1600_v52 = vadd.f32 %v1568_v30, %v1532_v11  ;;  %v1122_v46 = vadd.f32 %v1090_v59, %v1054_v10  ;;  %v1195_v51 = vmul.f32 %v4540_v24, %v3727_v50  ;;  %v3861_v30 = vld [vmem:[#allocation2 + $0x10a] sm:$0xff] }
 0x194   : > { %v2788_v13 = vpop.eup %2787  ;;  %v1857_v39 = vmul.f32 %v2786_v54, %v3678_v56  ;;  %v1601_v0 = vadd.f32 %v1569_v60, %v1533_v62  ;;  %v1123_v6 = vadd.f32 %v1091_v49, %v1055_v1  ;;  %v1262_v20 = vmul.f32 %v4533_v5, %v3781_v7 }
 0x195   : > { %v1858_v61 = vmul.f32 %v2788_v13, %v3681_v31  ;;  %v3850_v4 = vadd.f32 %v3390_v14, %v1600_v52  ;;  %v1226_v17 = vadd.f32 %v1194_v27, %v1122_v46  ;;  %v1263_v23 = vmul.f32 %v4533_v5, %v3783_v33 }
 0x196   : > { %v3855_v47 = vadd.f32 %v3390_v14, %v1601_v0  ;;  %v1227_v50 = vadd.f32 %v1195_v51, %v1123_v6  ;;  %v1330_v56 = vmul.f32 %v3148_v16, %v3839_v28  ;;  %v1331_v57 = vmul.f32 %v3148_v16, %v3841_v3 }
 0x197   : > { %v1884_v31 = vpack.c.bf16 %v1858_v61, %v1857_v39  ;;  %v2409_v19 = vmul.f32 -1.442695, %v3850_v4  ;;  %v1294_v60 = vadd.f32 %v1262_v20, %v1226_v17  ;;  %v1434_v21 = vmul.f32 %v3166_v38, %v3743_v8  ;;  %v3879_v8 = vld [vmem:[#allocation2 + $0x128] sm:$0xff] }
 0x198   : > { %v2410_v14 = vmul.f32 -1.442695, %v3855_v47  ;;  %v1295_v58 = vadd.f32 %v1263_v23, %v1227_v50  ;;  %v1435_v37 = vmul.f32 %v3166_v38, %v3747_v45  ;;  %v1502_v44 = vmul.f32 %v3168_v40, %v3800_v25 }
 0x199   : > { %2561 = vmatmul.mubr.bf16.gmra.mxu1 %v1884_v31  ;;  %2797 = vpow2.f32 %v2409_v19  ;;  %v1362_v55 = vadd.f32 %v1330_v56, %v1294_v60  ;;  %v1503_v34 = vmul.f32 %v3168_v40, %v3805_v22  ;;  %v1570_v35 = vmul.f32 %v3170_v41, %v3861_v30  ;;  %v3899_v56 = vld [vmem:[#allocation2 + $0x121] sm:$0xff] }
 0x19a   : > { %2799 = vpow2.f32 %v2410_v14  ;;  %v1363_v59 = vadd.f32 %v1331_v57, %v1295_v58  ;;  %v1571_v45 = vmul.f32 %v3170_v41, %v3864_v15  ;;  %v988_v36 = vmul.f32 %v4539_v18, %v3761_v43  ;;  %v3901_v57 = vld [vmem:[#allocation2 + $0x129] sm:$0xff]  ;;  %v3912_v14 = vld [vmem:[%s4502_s4] ss:$0 sm:$0xff] }
 0x19b   : > { %v2790_v11 = vpop.eup %2789  ;;  %v1466_v10 = vadd.f32 %v1434_v21, %v1362_v55  ;;  %v989_v49 = vmul.f32 %v4539_v18, %v3765_v29  ;;  %v1024_v62 = vmul.f32 %v3135_v63, %v3819_v53  ;;  %v1025_v1 = vmul.f32 %v3135_v63, %v3823_v9 }
 0x19c   : > { %v2792_v27 = vpop.eup %2791  ;;  %v1765_v54 = vadd.f32 1.0, %v2790_v11  ;;  %v1467_v52 = vadd.f32 %v1435_v37, %v1363_v59  ;;  %v1092_v46 = vmul.f32 %v3154_v26, %v3877_v32  ;;  %v1093_v43 = vmul.f32 %v3154_v26, %v3879_v8 }
 0x19d   : > { %v1766_v51 = vadd.f32 1.0, %v2792_v27  ;;  %v1534_v13 = vadd.f32 %v1502_v44, %v1466_v10  ;;  %v1056_v39 = vadd.f32 %v1024_v62, %v988_v36  ;;  %v1057_v0 = vadd.f32 %v1025_v1, %v989_v49  ;;  %v3929_v10 = vld [vmem:[#allocation2 + $0x12a] sm:$0xff] }
 0x19e   : > { %2801 = vrcp.f32 %v1765_v54  ;;  %v1535_v29 = vadd.f32 %v1503_v34, %v1467_v52  ;;  %v1196_v6 = vmul.f32 %v4540_v24, %v3781_v7  ;;  %v1197_v20 = vmul.f32 %v4540_v24, %v3783_v33 }
 0x19f   : > { %v2794_v61 = vpop.eup %2793  ;;  %2803 = vrcp.f32 %v1766_v51  ;;  %v1602_v17 = vadd.f32 %v1570_v35, %v1534_v13  ;;  %v1124_v23 = vadd.f32 %v1092_v46, %v1056_v39  ;;  %v1125_v50 = vadd.f32 %v1093_v43, %v1057_v0  ;;  %v3940_v46 = vld [vmem:[#allocation2 + $0x138] sm:$0xff]  ;;  %v3942_v43 = vld [vmem:[#allocation2 + $0x140] sm:$0xff] }
 0x1a0   : > { %v2796_v31 = vpop.eup %2795  ;;  %v1859_v19 = vmul.f32 %v2794_v61, %v3738_v48  ;;  %v1603_v60 = vadd.f32 %v1571_v45, %v1535_v29  ;;  %v1264_v21 = vmul.f32 %v4533_v5, %v3839_v28  ;;  %v1265_v7 = vmul.f32 %v4533_v5, %v3841_v3 }
 0x1a1   : > { %v1860_v33 = vmul.f32 %v2796_v31, %v3741_v12  ;;  %v3915_v58 = vadd.f32 %v3912_v14, %v1602_v17  ;;  %v1228_v37 = vadd.f32 %v1196_v6, %v1124_v23  ;;  %v1229_v44 = vadd.f32 %v1197_v20, %v1125_v50  ;;  %v3924_v12 = vld [vmem:[#allocation2 + $0x122] sm:$0xff] }
 0x1a2   : > { %v3918_v48 = vadd.f32 %v3912_v14, %v1603_v60  ;;  %v1332_v55 = vmul.f32 %v3148_v16, %v3899_v56  ;;  %v1333_v34 = vmul.f32 %v3148_v16, %v3901_v57  ;;  %v1436_v35 = vmul.f32 %v3166_v38, %v3800_v25  ;;  %v3958_v60 = vld [vmem:[#allocation2 + $0x139] sm:$0xff] }
 0x1a3   : > { %v1885_v59 = vpack.c.bf16 %v1860_v33, %v1859_v19  ;;  %v2411_v45 = vmul.f32 -1.442695, %v3915_v58  ;;  %v1296_v36 = vadd.f32 %v1264_v21, %v1228_v37  ;;  %v1297_v11 = vadd.f32 %v1265_v7, %v1229_v44 }
 0x1a4   : > { %v2412_v49 = vmul.f32 -1.442695, %v3918_v48  ;;  %v1437_v62 = vmul.f32 %v3166_v38, %v3805_v22  ;;  %v1504_v1 = vmul.f32 %v3168_v40, %v3861_v30  ;;  %v1505_v27 = vmul.f32 %v3168_v40, %v3864_v15 }
 0x1a5   : > { %2564 = vmatprep.mubr.bf16.mxu1 %v1885_v59  ;;  %2805 = vpow2.f32 %v2411_v45  ;;  %v1364_v25 = vadd.f32 %v1332_v55, %v1296_v36  ;;  %v1365_v54 = vadd.f32 %v1333_v34, %v1297_v11  ;;  %v1572_v52 = vmul.f32 %v3170_v41, %v3924_v12 }
 0x1a6   : > { %v2798_v51 = vpop.eup %2797  ;;  %2807 = vpow2.f32 %v2412_v49  ;;  %v1573_v22 = vmul.f32 %v3170_v41, %v3929_v10  ;;  %v990_v13 = vmul.f32 %v4539_v18, %v3819_v53  ;;  %v991_v39 = vmul.f32 %v4539_v18, %v3823_v9 }
 0x1a7   : > { %v2800_v0 = vpop.eup %2799  ;;  %v1767_v29 = vadd.f32 1.0, %v2798_v51  ;;  %v1468_v6 = vadd.f32 %v1436_v35, %v1364_v25  ;;  %v1469_v20 = vadd.f32 %v1437_v62, %v1365_v54  ;;  %v1026_v61 = vmul.f32 %v3135_v63, %v3877_v32  ;;  %v3964_v35 = vld [vmem:[#allocation2 + $0x141] sm:$0xff] }
 0x1a8   : > { %v1768_v17 = vadd.f32 1.0, %v2800_v0  ;;  %v1027_v23 = vmul.f32 %v3135_v63, %v3879_v8  ;;  %v1094_v50 = vmul.f32 %v3154_v26, %v3940_v46  ;;  %v1095_v53 = vmul.f32 %v3154_v26, %v3942_v43  ;;  %v3980_v25 = vld [vmem:[#allocation2 + $0x13a] sm:$0xff] }
 0x1a9   : > { %2809 = vrcp.f32 %v1767_v29  ;;  %v1536_v31 = vadd.f32 %v1504_v1, %v1468_v6  ;;  %v1537_v9 = vadd.f32 %v1505_v27, %v1469_v20  ;;  %v1058_v19 = vadd.f32 %v1026_v61, %v990_v13 }
 0x1aa   : > { %2811 = vrcp.f32 %v1768_v17  ;;  %v1059_v21 = vadd.f32 %v1027_v23, %v991_v39  ;;  %v1198_v7 = vmul.f32 %v4540_v24, %v3839_v28  ;;  %v1199_v33 = vmul.f32 %v4540_v24, %v3841_v3  ;;  %v4002_v23 = vld [vmem:[#allocation2 + $0x158] sm:$0xff] }
 0x1ab   : > { %v2802_v37 = vpop.eup %2801  ;;  %v1604_v44 = vadd.f32 %v1572_v52, %v1536_v31  ;;  %v1605_v55 = vadd.f32 %v1573_v22, %v1537_v9  ;;  %v1126_v34 = vadd.f32 %v1094_v50, %v1058_v19  ;;  %v1266_v59 = vmul.f32 %v4533_v5, %v3899_v56  ;;  %v3984_v52 = vld [vmem:[#allocation2 + $0x142] sm:$0xff] }
 0x1ac   : > { %v2804_v45 = vpop.eup %2803  ;;  %v1861_v36 = vmul.f32 %v2802_v37, %v3794_v2  ;;  %v1127_v11 = vadd.f32 %v1095_v53, %v1059_v21  ;;  %v1267_v49 = vmul.f32 %v4533_v5, %v3901_v57  ;;  %v1334_v28 = vmul.f32 %v3148_v16, %v3958_v60 }
 0x1ad   : > { %v1862_v3 = vmul.f32 %v2804_v45, %v3803_v42  ;;  %v3975_v62 = vadd.f32 %v3912_v14, %v1604_v44  ;;  %v3978_v1 = vadd.f32 %v3912_v14, %v1605_v55  ;;  %v1230_v27 = vadd.f32 %v1198_v7, %v1126_v34 }
 0x1ae   : > { %v1231_v54 = vadd.f32 %v1199_v33, %v1127_v11  ;;  %v1335_v2 = vmul.f32 %v3148_v16, %v3964_v35  ;;  %v1438_v51 = vmul.f32 %v3166_v38, %v3861_v30  ;;  %v1439_v42 = vmul.f32 %v3166_v38, %v3864_v15  ;;  %v3998_v30 = vld [vmem:[#allocation2 + $0x150] sm:$0xff] }
 0x1af   : > { %v1886_v22 = vpack.c.bf16 %v1862_v3, %v1861_v36  ;;  %v2413_v13 = vmul.f32 -1.442695, %v3975_v62  ;;  %v2414_v39 = vmul.f32 -1.442695, %v3978_v1  ;;  %v1298_v0 = vadd.f32 %v1266_v59, %v1230_v27  ;;  %v4018_v3 = vld [vmem:[#allocation2 + $0x151] sm:$0xff]  ;;  %v4020_v27 = vld [vmem:[#allocation2 + $0x159] sm:$0xff] }
 0x1b0   : > { %v1299_v29 = vadd.f32 %v1267_v49, %v1231_v54  ;;  %v1506_v6 = vmul.f32 %v3168_v40, %v3924_v12  ;;  %v1507_v20 = vmul.f32 %v3168_v40, %v3929_v10  ;;  %v1574_v61 = vmul.f32 %v3170_v41, %v3980_v25 }
 0x1b1   : > { %2565 = vmatmul.mubr.bf16.gmra.mxu1 %v1886_v22  ;;  %2813 = vpow2.f32 %v2413_v13  ;;  %v1366_v15 = vadd.f32 %v1334_v28, %v1298_v0  ;;  %v1575_v17 = vmul.f32 %v3170_v41, %v3984_v52  ;;  %v992_v50 = vmul.f32 %v4539_v18, %v3877_v32 }
 0x1b2   : > { %v2806_v53 = vpop.eup %2805  ;;  %2815 = vpow2.f32 %v2414_v39  ;;  %v1367_v31 = vadd.f32 %v1335_v2, %v1299_v29  ;;  %v993_v9 = vmul.f32 %v4539_v18, %v3879_v8  ;;  %v1028_v19 = vmul.f32 %v3135_v63, %v3940_v46 }
 0x1b3   : > { %v2808_v21 = vpop.eup %2807  ;;  %v1769_v7 = vadd.f32 1.0, %v2806_v53  ;;  %v1470_v33 = vadd.f32 %v1438_v51, %v1366_v15  ;;  %v1029_v37 = vmul.f32 %v3135_v63, %v3942_v43  ;;  %v1096_v44 = vmul.f32 %v3154_v26, %v3998_v30 }
 0x1b4   : > { %v1770_v55 = vadd.f32 1.0, %v2808_v21  ;;  %v1471_v32 = vadd.f32 %v1439_v42, %v1367_v31  ;;  %v1060_v34 = vadd.f32 %v1028_v19, %v992_v50  ;;  %v1097_v59 = vmul.f32 %v3154_v26, %v4002_v23  ;;  %v4042_v50 = vld [vmem:[#allocation2 + $0x15a] sm:$0xff] }
 0x1b5   : > { %2817 = vrcp.f32 %v1769_v7  ;;  %v1538_v8 = vadd.f32 %v1506_v6, %v1470_v33  ;;  %v1061_v45 = vadd.f32 %v1029_v37, %v993_v9  ;;  %v1200_v36 = vmul.f32 %v4540_v24, %v3899_v56 }
 0x1b6   : > { %v2810_v11 = vpop.eup %2809  ;;  %2819 = vrcp.f32 %v1770_v55  ;;  %v1539_v49 = vadd.f32 %v1507_v20, %v1471_v32  ;;  %v1128_v28 = vadd.f32 %v1096_v44, %v1060_v34  ;;  %v1201_v54 = vmul.f32 %v4540_v24, %v3901_v57  ;;  %v4060_v32 = vld [vmem:[#allocation2 + $0x170] sm:$0xff] }
 0x1b7   : > { %v2812_v2 = vpop.eup %2811  ;;  %v1863_v51 = vmul.f32 %v2810_v11, %v3850_v4  ;;  %v1606_v42 = vadd.f32 %v1574_v61, %v1538_v8  ;;  %v1129_v22 = vadd.f32 %v1097_v59, %v1061_v45  ;;  %v1268_v13 = vmul.f32 %v4533_v5, %v3958_v60  ;;  %v4037_v61 = vld [vmem:[#allocation2 + $0x152] sm:$0xff] }
 0x1b8   : > { %v1864_v56 = vmul.f32 %v2812_v2, %v3855_v47  ;;  %v1607_v39 = vadd.f32 %v1575_v17, %v1539_v49  ;;  %v1232_v0 = vadd.f32 %v1200_v36, %v1128_v28  ;;  %v1269_v29 = vmul.f32 %v4533_v5, %v3964_v35 }
 0x1b9   : > { %v4031_v6 = vadd.f32 %v3912_v14, %v1606_v42  ;;  %v1233_v20 = vadd.f32 %v1201_v54, %v1129_v22  ;;  %v1336_v57 = vmul.f32 %v3148_v16, %v4018_v3  ;;  %v1337_v4 = vmul.f32 %v3148_v16, %v4020_v27 }
 0x1ba   : > { %v1887_v15 = vpack.c.bf16 %v1864_v56, %v1863_v51  ;;  %v4040_v47 = vadd.f32 %v3912_v14, %v1607_v39  ;;  %v1300_v17 = vadd.f32 %v1268_v13, %v1232_v0  ;;  %v1440_v53 = vmul.f32 %v3166_v38, %v3924_v12  ;;  %v4056_v12 = vld [vmem:[#allocation2 + $0x168] sm:$0xff] }
 0x1bb   : > { %v2415_v31 = vmul.f32 -1.442695, %v4031_v6  ;;  %v1301_v9 = vadd.f32 %v1269_v29, %v1233_v20  ;;  %v1441_v19 = vmul.f32 %v3166_v38, %v3929_v10  ;;  %v1508_v21 = vmul.f32 %v3168_v40, %v3980_v25  ;;  %v4076_v20 = vld [vmem:[#allocation2 + $0x169] sm:$0xff] }
 0x1bc   : > { %2568 = vmatprep.mubr.bf16.mxu1 %v1887_v15  ;;  %v2416_v7 = vmul.f32 -1.442695, %v4040_v47  ;;  %v1368_v33 = vadd.f32 %v1336_v57, %v1300_v17  ;;  %v1509_v37 = vmul.f32 %v3168_v40, %v3984_v52  ;;  %v1576_v44 = vmul.f32 %v3170_v41, %v4037_v61  ;;  %v4078_v57 = vld [vmem:[#allocation2 + $0x171] sm:$0xff] }
 0x1bd   : > { %2821 = vpow2.f32 %v2415_v31  ;;  %v1369_v55 = vadd.f32 %v1337_v4, %v1301_v9  ;;  %v1577_v10 = vmul.f32 %v3170_v41, %v4042_v50  ;;  %v994_v34 = vmul.f32 %v4539_v18, %v3940_v46 }
 0x1be   : > { %v2814_v59 = vpop.eup %2813  ;;  %2823 = vpow2.f32 %v2416_v7  ;;  %v1472_v8 = vadd.f32 %v1440_v53, %v1368_v33  ;;  %v995_v45 = vmul.f32 %v4539_v18, %v3942_v43  ;;  %v1030_v36 = vmul.f32 %v3135_v63, %v3998_v30 }
 0x1bf   : > { %v2816_v11 = vpop.eup %2815  ;;  %v1771_v49 = vadd.f32 1.0, %v2814_v59  ;;  %v1473_v28 = vadd.f32 %v1441_v19, %v1369_v55  ;;  %v1031_v54 = vmul.f32 %v3135_v63, %v4002_v23  ;;  %v1098_v2 = vmul.f32 %v3154_v26, %v4056_v12 }
 0x1c0   : > { %v1772_v51 = vadd.f32 1.0, %v2816_v11  ;;  %v1540_v46 = vadd.f32 %v1508_v21, %v1472_v8  ;;  %v1062_v42 = vadd.f32 %v1030_v36, %v994_v34  ;;  %v1099_v22 = vmul.f32 %v3154_v26, %v4060_v32  ;;  %v4101_v34 = vld [vmem:[#allocation2 + $0x172] sm:$0xff] }
 0x1c1   : > { %2825 = vrcp.f32 %v1771_v49  ;;  %v1541_v43 = vadd.f32 %v1509_v37, %v1473_v28  ;;  %v1063_v13 = vadd.f32 %v1031_v54, %v995_v45  ;;  %v1202_v56 = vmul.f32 %v4540_v24, %v3958_v60 }
 0x1c2   : > { %v2818_v39 = vpop.eup %2817  ;;  %2827 = vrcp.f32 %v1772_v51  ;;  %v1608_v0 = vadd.f32 %v1576_v44, %v1540_v46  ;;  %v1130_v29 = vadd.f32 %v1098_v2, %v1062_v42  ;;  %v1203_v4 = vmul.f32 %v4540_v24, %v3964_v35  ;;  %v4098_v44 = vld [vmem:[#allocation2 + $0x16a] sm:$0xff]  ;;  %v4114_v2 = vld [vmem:[#allocation2 + $0x180] sm:$0xff] }
 0x1c3   : > { %v2820_v15 = vpop.eup %2819  ;;  %v1865_v17 = vmul.f32 %v2818_v39, %v3915_v58  ;;  %v1609_v53 = vadd.f32 %v1577_v10, %v1541_v43  ;;  %v1131_v31 = vadd.f32 %v1099_v22, %v1063_v13  ;;  %v1270_v9 = vmul.f32 %v4533_v5, %v4018_v3 }
 0x1c4   : > { %v1866_v60 = vmul.f32 %v2820_v15, %v3918_v48  ;;  %v4087_v19 = vadd.f32 %v3912_v14, %v1608_v0  ;;  %v1234_v21 = vadd.f32 %v1202_v56, %v1130_v29  ;;  %v1271_v7 = vmul.f32 %v4533_v5, %v4020_v27 }
 0x1c5   : > { %v4092_v33 = vadd.f32 %v3912_v14, %v1609_v53  ;;  %v1235_v35 = vadd.f32 %v1203_v4, %v1131_v31  ;;  %v1338_v58 = vmul.f32 %v3148_v16, %v4076_v20  ;;  %v1339_v37 = vmul.f32 %v3148_v16, %v4078_v57 }
 0x1c6   : > { %v1888_v48 = vpack.c.bf16 %v1866_v60, %v1865_v17  ;;  %v2417_v55 = vmul.f32 -1.442695, %v4087_v19  ;;  %v1302_v10 = vadd.f32 %v1270_v9, %v1234_v21  ;;  %v1442_v59 = vmul.f32 %v3166_v38, %v3980_v25  ;;  %v4116_v25 = vld [vmem:[#allocation2 + $0x188] sm:$0xff] }
 0x1c7   : > { %v2418_v8 = vmul.f32 -1.442695, %v4092_v33  ;;  %v1303_v45 = vadd.f32 %v1271_v7, %v1235_v35  ;;  %v1443_v36 = vmul.f32 %v3166_v38, %v3984_v52  ;;  %v1510_v11 = vmul.f32 %v3168_v40, %v4037_v61 }
 0x1c8   : > { %2569 = vmatmul.mubr.bf16.gmra.mxu1 %v1888_v48  ;;  %2829 = vpow2.f32 %v2417_v55  ;;  %v1370_v49 = vadd.f32 %v1338_v58, %v1302_v10  ;;  %v1511_v28 = vmul.f32 %v3168_v40, %v4042_v50  ;;  %v1578_v54 = vmul.f32 %v3170_v41, %v4098_v44  ;;  %v4136_v48 = vld [vmem:[#allocation2 + $0x189] sm:$0xff] }
 0x1c9   : > { %2831 = vpow2.f32 %v2418_v8  ;;  %v1371_v51 = vadd.f32 %v1339_v37, %v1303_v45  ;;  %v1579_v52 = vmul.f32 %v3170_v41, %v4101_v34  ;;  %v996_v46 = vmul.f32 %v4539_v18, %v3998_v30  ;;  %v1168_v37 = vld [vmem:[#allocation2 + $0x181] sm:$0xff] }
 0x1ca   : > { %v2822_v42 = vpop.eup %2821  ;;  %v1474_v22 = vadd.f32 %v1442_v59, %v1370_v49  ;;  %v997_v43 = vmul.f32 %v4539_v18, %v4002_v23  ;;  %v1032_v13 = vmul.f32 %v3135_v63, %v4056_v12  ;;  %v1033_v56 = vmul.f32 %v3135_v63, %v4060_v32 }
 0x1cb   : > { %v2824_v39 = vpop.eup %2823  ;;  %v1773_v0 = vadd.f32 1.0, %v2822_v42  ;;  %v1475_v29 = vadd.f32 %v1443_v36, %v1371_v51  ;;  %v1100_v4 = vmul.f32 %v3154_v26, %v4114_v2  ;;  %v1101_v30 = vmul.f32 %v3154_v26, %v4116_v25  ;;  %v4154_v42 = vld [vmem:[#allocation2 + $0x182] sm:$0xff] }
 0x1cc   : > { %v1774_v15 = vadd.f32 1.0, %v2824_v39  ;;  %v1542_v17 = vadd.f32 %v1510_v11, %v1474_v22  ;;  %v1064_v53 = vadd.f32 %v1032_v13, %v996_v46  ;;  %v1065_v31 = vadd.f32 %v1033_v56, %v997_v43 }
 0x1cd   : > { %2833 = vrcp.f32 %v1773_v0  ;;  %v1543_v23 = vadd.f32 %v1511_v28, %v1475_v29  ;;  %v1204_v9 = vmul.f32 %v4540_v24, %v4018_v3  ;;  %v1205_v60 = vmul.f32 %v4540_v24, %v4020_v27  ;;  %v4163_v0 = vld [vmem:[#allocation2 + $0x18a] sm:$0xff] }
 0x1ce   : > { %v2826_v21 = vpop.eup %2825  ;;  %2835 = vrcp.f32 %v1774_v15  ;;  %v1610_v7 = vadd.f32 %v1578_v54, %v1542_v17  ;;  %v1132_v35 = vadd.f32 %v1100_v4, %v1064_v53  ;;  %v1133_v58 = vadd.f32 %v1101_v30, %v1065_v31 }
 0x1cf   : > { %v2828_v55 = vpop.eup %2827  ;;  %v1867_v10 = vmul.f32 %v2826_v21, %v3975_v62  ;;  %v1611_v59 = vadd.f32 %v1579_v52, %v1543_v23  ;;  %v1272_v8 = vmul.f32 %v4533_v5, %v4076_v20  ;;  %v1273_v3 = vmul.f32 %v4533_v5, %v4078_v57 }
 0x1d0   : > { %v1868_v27 = vmul.f32 %v2828_v55, %v3978_v1  ;;  %v4145_v45 = vadd.f32 %v3912_v14, %v1610_v7  ;;  %v1236_v36 = vadd.f32 %v1204_v9, %v1132_v35  ;;  %v1237_v11 = vadd.f32 %v1205_v60, %v1133_v58  ;;  %v2874_v7 = vld [vmem:[#allocation2] sm:$0xff] }
 0x1d1   : > { %v4148_v49 = vadd.f32 %v3912_v14, %v1611_v59  ;;  %v1340_v28 = vmul.f32 %v3148_v16, %v1168_v37  ;;  %v1341_v62 = vmul.f32 %v3148_v16, %v4136_v48  ;;  %v1444_v22 = vmul.f32 %v3166_v38, %v4037_v61  ;;  %v1170_v58 = vld [vmem:[#allocation2 + $0x199] sm:$0xff] }
 0x1d2   : > { %v1889_v54 = vpack.c.bf16 %v1868_v27, %v1867_v10  ;;  %v2419_v51 = vmul.f32 -1.442695, %v4145_v45  ;;  %v1304_v52 = vadd.f32 %v1272_v8, %v1236_v36  ;;  %v1305_v46 = vadd.f32 %v1273_v3, %v1237_v11  ;;  %v1171_v27 = vld [vmem:[#allocation2 + $0x1a1] sm:$0xff] }
 0x1d3   : > { %v2420_v1 = vmul.f32 -1.442695, %v4148_v49  ;;  %v1445_v43 = vmul.f32 %v3166_v38, %v4042_v50  ;;  %v1512_v13 = vmul.f32 %v3168_v40, %v4098_v44  ;;  %v1513_v29 = vmul.f32 %v3168_v40, %v4101_v34 }
 0x1d4   : > { %2572 = vmatprep.mubr.bf16.mxu1 %v1889_v54  ;;  %2837 = vpow2.f32 %v2419_v51  ;;  %v1372_v56 = vadd.f32 %v1340_v28, %v1304_v52  ;;  %v1373_v39 = vadd.f32 %v1341_v62, %v1305_v46  ;;  %v1580_v61 = vmul.f32 %v3170_v41, %v4154_v42 }
 0x1d5   : > { %v2830_v4 = vpop.eup %2829  ;;  %2839 = vpow2.f32 %v2420_v1  ;;  %v998_v50 = vmul.f32 %v4539_v18, %v4056_v12  ;;  %v999_v30 = vmul.f32 %v4539_v18, %v4060_v32  ;;  %v1034_v23 = vmul.f32 %v3135_v63, %v4114_v2 }
 0x1d6   : > { %v2832_v15 = vpop.eup %2831  ;;  %v1775_v17 = vadd.f32 1.0, %v2830_v4  ;;  %v1476_v53 = vadd.f32 %v1444_v22, %v1372_v56  ;;  %v1477_v31 = vadd.f32 %v1445_v43, %v1373_v39  ;;  %v1581_v60 = vmul.f32 %v3170_v41, %v4163_v0  ;;  %v1410_v22 = vld [vmem:[#allocation2 + $0x19a] sm:$0xff] }
 0x1d7   : > { %v1776_v9 = vadd.f32 1.0, %v2832_v15  ;;  %v1035_v21 = vmul.f32 %v3135_v63, %v4116_v25  ;;  %v1102_v12 = vmul.f32 %v2874_v7, %v3154_v26  ;;  %v1066_v32 = vadd.f32 %v1034_v23, %v998_v50 }
 0x1d8   : > { %2841 = vrcp.f32 %v1775_v17  ;;  %v1544_v35 = vadd.f32 %v1512_v13, %v1476_v53  ;;  %v1545_v18 = vadd.f32 %v1513_v29, %v1477_v31  ;;  %v1206_v2 = vmul.f32 %v4540_v24, %v4076_v20  ;;  %v1411_v13 = vld [vmem:[#allocation2 + $0x1a2] sm:$0xff] }
 0x1d9   : > { %2843 = vrcp.f32 %v1776_v9  ;;  %v1067_v55 = vadd.f32 %v1035_v21, %v999_v30  ;;  %v1134_v3 = vadd.f32 %v1102_v12, %v1066_v32  ;;  %v1207_v63 = vmul.f32 %v4540_v24, %v4078_v57 }
 0x1da   : > { %v2834_v10 = vpop.eup %2833  ;;  %v1612_v59 = vadd.f32 %v1580_v61, %v1544_v35  ;;  %v1613_v8 = vadd.f32 %v1581_v60, %v1545_v18  ;;  %v1274_v11 = vmul.f32 %v4533_v5, %v1168_v37  ;;  %v1342_v28 = vmul.f32 %v3148_v16, %v1170_v58 }
 0x1db   : > { %v2836_v25 = vpop.eup %2835  ;;  %v1869_v26 = vmul.f32 %v2834_v10, %v4031_v6  ;;  %v1135_v36 = vadd.f32 %v1102_v12, %v1067_v55  ;;  %v1238_v51 = vadd.f32 %v1206_v2, %v1134_v3  ;;  %v1275_v24 = vmul.f32 %v4533_v5, %v4136_v48 }
 0x1dc   : > { %v1870_v62 = vmul.f32 %v2836_v25, %v4040_v47  ;;  %v4189_v20 = vadd.f32 %v3912_v14, %v1612_v59  ;;  %v4192_v54 = vadd.f32 %v3912_v14, %v1613_v8  ;;  %v1343_v6 = vmul.f32 %v3148_v16, %v1171_v27 }
 0x1dd   : > { %v1239_v52 = vadd.f32 %v1207_v63, %v1135_v36  ;;  %v1306_v1 = vadd.f32 %v1274_v11, %v1238_v51  ;;  %v1446_v56 = vmul.f32 %v3166_v38, %v4098_v44  ;;  %v1447_v16 = vmul.f32 %v3166_v38, %v4101_v34 }
 0x1de   : > { %v1890_v57 = vpack.c.bf16 %v1870_v62, %v1869_v26  ;;  %v2421_v37 = vmul.f32 -1.442695, %v4189_v20  ;;  %v2422_v46 = vmul.f32 -1.442695, %v4192_v54  ;;  %v1514_v61 = vmul.f32 %v3168_v40, %v4154_v42 }
 0x1df   : > { %v1307_v47 = vadd.f32 %v1275_v24, %v1239_v52  ;;  %v1374_v43 = vadd.f32 %v1342_v28, %v1306_v1  ;;  %v1582_v50 = vmul.f32 %v3170_v41, %v1410_v22  ;;  %v1515_v17 = vmul.f32 %v3168_v40, %v4163_v0 }
 0x1e0   : > { %2573 = vmatmul.mubr.bf16.gmra.mxu1 %v1890_v57  ;;  %2845 = vpow2.f32 %v2421_v37  ;;  %v1583_v44 = vmul.f32 %v3170_v41, %v1411_v13 }
 0x1e1   : > { %v2838_v39 = vpop.eup %2837  ;;  %2847 = vpow2.f32 %v2422_v46  ;;  %v1375_v5 = vadd.f32 %v1343_v6, %v1307_v47  ;;  %v1478_v4 = vadd.f32 %v1446_v56, %v1374_v43  ;;  %v4220_v6 = vld [vmem:[%s4504_s6] ss:$0 sm:$0xff] }
 0x1e2   : > { %v2840_v48 = vpop.eup %2839  ;;  %v1777_v29 = vadd.f32 1.0, %v2838_v39 }
 0x1e3   : > { %v1778_v30 = vadd.f32 1.0, %v2840_v48  ;;  %v1479_v15 = vadd.f32 %v1447_v16, %v1375_v5  ;;  %v1546_v53 = vadd.f32 %v1514_v61, %v1478_v4 }
 0x1e4   : > { %2849 = vrcp.f32 %v1777_v29 }
 0x1e5   : > { %v2842_v31 = vpop.eup %2841  ;;  %2851 = vrcp.f32 %v1778_v30  ;;  %v1547_v38 = vadd.f32 %v1515_v17, %v1479_v15  ;;  %v1614_v23 = vadd.f32 %v1582_v50, %v1546_v53 }
 0x1e6   : > { %v2844_v34 = vpop.eup %2843  ;;  %v1871_v9 = vmul.f32 %v2842_v31, %v4087_v19 }
 0x1e7   : > { %v1872_v42 = vmul.f32 %v2844_v34, %v4092_v33  ;;  %v1615_v60 = vadd.f32 %v1583_v44, %v1547_v38  ;;  %v1653_v21 = vadd.f32 %v3912_v14, %v1614_v23 }
 0x1e9   : > { %v1891_v7 = vpack.c.bf16 %v1872_v42, %v1871_v9  ;;  %v1654_v12 = vadd.f32 %v3912_v14, %v1615_v60  ;;  %v2423_v40 = vmul.f32 -1.442695, %v1653_v21 }
 0x1eb   : > { %2576 = vmatprep.mubr.bf16.mxu1 %v1891_v7  ;;  %v2424_v41 = vmul.f32 -1.442695, %v1654_v12  ;;  %2853 = vpow2.f32 %v2423_v40 }
 0x1ed   : > { %v2846_v0 = vpop.eup %2845  ;;  %2855 = vpow2.f32 %v2424_v41 }
 0x1ee   : > { %v2848_v35 = vpop.eup %2847  ;;  %v1779_v18 = vadd.f32 1.0, %v2846_v0 }
 0x1ef   : > { %v1780_v32 = vadd.f32 1.0, %v2848_v35 }
 0x1f0   : > { %2857 = vrcp.f32 %v1779_v18 }
 0x1f1   : > { %v2850_v58 = vpop.eup %2849  ;;  %2859 = vrcp.f32 %v1780_v32 }
 0x1f2   : > { %v2852_v19 = vpop.eup %2851  ;;  %v1873_v33 = vmul.f32 %v2850_v58, %v4145_v45 }
 0x1f3   : > { %v1874_v55 = vmul.f32 %v2852_v19, %v4148_v49 }
 0x1f5   : > { %v1892_v2 = vpack.c.bf16 %v1874_v55, %v1873_v33 }
 0x1f7   : > { %2577 = vmatmul.mubr.bf16.gmra.mxu1 %v1892_v2 }
 0x1f8   : > { %v2854_v14 = vpop.eup %2853 }
 0x1f9   : > { %v1781_v59 = vadd.f32 1.0, %v2854_v14 }
 0x1fa   : > { %v2856_v10 = vpop.eup %2855 }
 0x1fb   : > { %v1782_v8 = vadd.f32 1.0, %v2856_v10  ;;  %2861 = vrcp.f32 %v1781_v59 }
 0x1fd   : > { %v2858_v3 = vpop.eup %2857  ;;  %2863 = vrcp.f32 %v1782_v8 }
 0x1fe   : > { %v2860_v27 = vpop.eup %2859  ;;  %v1875_v63 = vmul.f32 %v2858_v3, %v4189_v20 }
 0x1ff   : > { %v1876_v25 = vmul.f32 %v2860_v27, %v4192_v54 }
 0x201   : > { %v1893_v26 = vpack.c.bf16 %v1876_v25, %v1875_v63 }
 0x203   : > { %2580 = vmatprep.mubr.bf16.mxu1 %v1893_v26 }
 0x208   : > { %v2862_v36 = vpop.eup %2861 }
 0x209   : > { %v1877_v11 = vmul.f32 %v2862_v36, %v1653_v21 }
 0x20a   : > { %v2864_v45 = vpop.eup %2863 }
 0x20b   : > { %v1878_v49 = vmul.f32 %v2864_v45, %v1654_v12 }
 0x20d   : > { %v1894_v28 = vpack.c.bf16 %v1878_v49, %v1877_v11 }
 0x20f   : > { %2581 = vmatmul.mubr.bf16.gmra.mxu1 %v1894_v28 }
 0x22c   : > { %v2554_v62 = vpop.f32.mrf.mxu1 }
 0x22d   : > { %v4231_v1 = vadd.f32 %v2554_v62, %v4220_v6 }
 0x22e   : > { %v2000_v51 = vpop.f32.mrf.mxu1 }
 0x22f   : > { %v4226_v57 = vadd.f32 %v4220_v6, %v2000_v51 }
 0x230   : > { %v2555_v52 = vpop.f32.mrf.mxu1 }
 0x231   : > { %v4235_v43 = vadd.f32 %v2555_v52, %v4220_v6 }
 0x232   : > { %v2003_v24 = vpop.f32.mrf.mxu1 }
 0x233   : > { %v4223_v20 = vadd.f32 %v4220_v6, %v2003_v24 }
 0x235   : > { %v2127_v37 = vadd.f32 %v4223_v20, %v4226_v57 }
 0x237   : > { %v2128_v47 = vadd.f32 %v2127_v37, %v4231_v1 }
 0x239   : > { %v2129_v13 = vadd.f32 %v2128_v47, %v4235_v43 }
 0x242   : > { %v2558_v54 = vpop.f32.mrf.mxu1 }
 0x243   : > { %v4247_v61 = vadd.f32 %v2558_v54, %v4220_v6 }
 0x244   : > { %v2016_v46 = vpop.f32.mrf.mxu1 }
 0x245   : > { %v4239_v39 = vadd.f32 %v4220_v6, %v2016_v46 }
 0x246   : > { %v2559_v22 = vpop.f32.mrf.mxu1 }
 0x247   : > { %v2130_v5 = vadd.f32 %v2129_v13, %v4239_v39  ;;  %v4251_v15 = vadd.f32 %v2559_v22, %v4220_v6 }
 0x248   : > { %v2019_v56 = vpop.f32.mrf.mxu1 }
 0x249   : > { %v4243_v16 = vadd.f32 %v4220_v6, %v2019_v56 }
 0x24b   : > { %v2131_v29 = vadd.f32 %v2130_v5, %v4243_v16 }
 0x24d   : > { %v2132_v50 = vadd.f32 %v2131_v29, %v4247_v61 }
 0x24f   : > { %v2133_v17 = vadd.f32 %v2132_v50, %v4251_v15 }
 0x259   : > { %v2562_v48 = vpop.f32.mrf.mxu1 }
 0x25a   : > { %v4263_v42 = vadd.f32 %v2562_v48, %v4220_v6 }
 0x25b   : > { %v2032_v4 = vpop.f32.mrf.mxu1 }
 0x25c   : > { %v4255_v53 = vadd.f32 %v4220_v6, %v2032_v4 }
 0x25d   : > { %v2563_v30 = vpop.f32.mrf.mxu1 }
 0x25e   : > { %v2134_v31 = vadd.f32 %v2133_v17, %v4255_v53  ;;  %v4267_v7 = vadd.f32 %v2563_v30, %v4220_v6 }
 0x25f   : > { %v2035_v44 = vpop.f32.mrf.mxu1 }
 0x260   : > { %v4259_v38 = vadd.f32 %v4220_v6, %v2035_v44 }
 0x262   : > { %v2135_v23 = vadd.f32 %v2134_v31, %v4259_v38 }
 0x264   : > { %v2136_v60 = vadd.f32 %v2135_v23, %v4263_v42 }
 0x266   : > { %v2137_v12 = vadd.f32 %v2136_v60, %v4267_v7 }
 0x271   : > { %v2566_v34 = vpop.f32.mrf.mxu1 }
 0x272   : > { %v4279_v19 = vadd.f32 %v2566_v34, %v4220_v6 }
 0x273   : > { %v2048_v9 = vpop.f32.mrf.mxu1 }
 0x274   : > { %v4271_v41 = vadd.f32 %v4220_v6, %v2048_v9 }
 0x275   : > { %v2567_v21 = vpop.f32.mrf.mxu1 }
 0x276   : > { %v2138_v0 = vadd.f32 %v2137_v12, %v4271_v41  ;;  %v4283_v2 = vadd.f32 %v2567_v21, %v4220_v6 }
 0x277   : > { %v2051_v40 = vpop.f32.mrf.mxu1 }
 0x278   : > { %v4275_v35 = vadd.f32 %v4220_v6, %v2051_v40 }
 0x27a   : > { %v2139_v32 = vadd.f32 %v2138_v0, %v4275_v35 }
 0x27c   : > { %v2140_v33 = vadd.f32 %v2139_v32, %v4279_v19 }
 0x27e   : > { %v2141_v14 = vadd.f32 %v2140_v33, %v4283_v2 }
 0x288   : > { %v2570_v18 = vpop.f32.mrf.mxu1 }
 0x289   : > { %v4295_v26 = vadd.f32 %v2570_v18, %v4220_v6 }
 0x28a   : > { %v2064_v58 = vpop.f32.mrf.mxu1 }
 0x28b   : > { %v4287_v59 = vadd.f32 %v4220_v6, %v2064_v58 }
 0x28c   : > { %v2571_v55 = vpop.f32.mrf.mxu1 }
 0x28d   : > { %v2142_v8 = vadd.f32 %v2141_v14, %v4287_v59  ;;  %v4299_v11 = vadd.f32 %v2571_v55, %v4220_v6 }
 0x28e   : > { %v2067_v10 = vpop.f32.mrf.mxu1 }
 0x28f   : > { %v4291_v3 = vadd.f32 %v4220_v6, %v2067_v10 }
 0x291   : > { %v2143_v63 = vadd.f32 %v2142_v8, %v4291_v3 }
 0x293   : > { %v2144_v36 = vadd.f32 %v2143_v63, %v4295_v26 }
 0x295   : > { %v2145_v49 = vadd.f32 %v2144_v36, %v4299_v11 }
 0x2a0   : > { %v2574_v27 = vpop.f32.mrf.mxu1 }
 0x2a1   : > { %v4311_v46 = vadd.f32 %v2574_v27, %v4220_v6 }
 0x2a2   : > { %v2080_v25 = vpop.f32.mrf.mxu1 }
 0x2a3   : > { %v4303_v62 = vadd.f32 %v4220_v6, %v2080_v25  ;;  %v2166_v25 = vld [vmem:[%s4505_s7] sm:$0xff] }
 0x2a4   : > { %v2575_v45 = vpop.f32.mrf.mxu1 }
 0x2a5   : > { %v2146_v51 = vadd.f32 %v2145_v49, %v4303_v62  ;;  %v4315_v13 = vadd.f32 %v2575_v45, %v4220_v6 }
 0x2a6   : > { %v2083_v28 = vpop.f32.mrf.mxu1 }
 0x2a7   : > { %v4307_v52 = vadd.f32 %v4220_v6, %v2083_v28 }
 0x2a9   : > { %v2147_v54 = vadd.f32 %v2146_v51, %v4307_v52 }
 0x2ab   : > { %v2148_v47 = vadd.f32 %v2147_v54, %v4311_v46  ;;  %v2177_v54 = vld [vmem:[%s4506_s8] sm:$0xff] }
 0x2ad   : > { %v2149_v56 = vadd.f32 %v2148_v47, %v4315_v13 }
 0x2b7   : > { %v2578_v24 = vpop.f32.mrf.mxu1 }
 0x2b8   : > { %v4327_v30 = vadd.f32 %v2578_v24, %v4220_v6 }
 0x2b9   : > { %v2096_v37 = vpop.f32.mrf.mxu1 }
 0x2ba   : > { %v4319_v48 = vadd.f32 %v4220_v6, %v2096_v37 }
 0x2bb   : > { %v2579_v22 = vpop.f32.mrf.mxu1 }
 0x2bc   : > { %v2150_v29 = vadd.f32 %v2149_v56, %v4319_v48  ;;  %v4331_v44 = vadd.f32 %v2579_v22, %v4220_v6 }
 0x2bd   : > { %v2099_v5 = vpop.f32.mrf.mxu1 }
 0x2be   : > { %v4323_v4 = vadd.f32 %v4220_v6, %v2099_v5 }
 0x2c0   : > { %v2151_v50 = vadd.f32 %v2150_v29, %v4323_v4 }
 0x2c2   : > { %v2152_v17 = vadd.f32 %v2151_v50, %v4327_v30 }
 0x2c4   : > { %v2153_v34 = vadd.f32 %v2152_v17, %v4331_v44 }
 0x2cf   : > { %v2582_v31 = vpop.f32.mrf.mxu1 }
 0x2d0   : > { %v4342_v0 = vadd.f32 %v2582_v31, %v4220_v6 }
 0x2d1   : > { %v2112_v23 = vpop.f32.mrf.mxu1 }
 0x2d2   : > { %v4335_v9 = vadd.f32 %v4220_v6, %v2112_v23 }
 0x2d3   : > { %v2583_v60 = vpop.f32.mrf.mxu1 }
 0x2d4   : > { %v2154_v21 = vadd.f32 %v2153_v34, %v4335_v9  ;;  %v4346_v32 = vadd.f32 %v2583_v60, %v4220_v6 }
 0x2d5   : > { %v2115_v12 = vpop.f32.mrf.mxu1 }
 0x2d6   : > { %v4339_v40 = vadd.f32 %v4220_v6, %v2115_v12 }
 0x2d8   : > { %v2155_v18 = vadd.f32 %v2154_v21, %v4339_v40 }
 0x2da   : > { %v2156_v58 = vadd.f32 %v2155_v18, %v4342_v0 }
 0x2dc   : > { %v2157_v33 = vadd.f32 %v2156_v58, %v4346_v32 }
 0x2de   : > { %v2158_v55 = vrot.slane %v2157_v33, 4 }
 0x2e0   : > { %v2159_v14 = vadd.f32 %v2158_v55, %v2157_v33 }
 0x2e2   : > { %v2160_v10 = vrot.slane %v2159_v14, 2 }
 0x2e4   : > { %v2161_v8 = vadd.f32 %v2160_v10, %v2159_v14 }
 0x2e6   : > { %v2162_v27 = vrot.slane %v2161_v8, 1 }
 0x2e8   : > { %v2163_v63 = vadd.f32 %v2162_v27, %v2161_v8 }
 0x2ea   : > { %v2165_v36 = vmul.f32 0.00390625, %v2163_v63  ;;  %v2879_v63 = vld [vmem:[%s2991_s20 + $0x20] sm:$0xff] }
 0x2ec   : > { %v2167_v45 = vmul.f32 %v2166_v25, %v2165_v36  ;;  %v2880_v25 = vld [vmem:[%s2991_s20 + $0x28] sm:$0xff]  ;;  %v2881_v36 = vld [vmem:[%s2991_s20 + $0x30] sm:$0xff] }
 0x2ee   : > { %2168 = vadd.xlane.f32.xlu0 %v2167_v45 }
 0x377   : > { %v2169_v49 = vpop.xlane.xlu0 %2168 }
 0x378   : > { %v2434_v6 = vmul.f32 -1.442695, %v2169_v49 }
 0x37a   : > { %2865 = vpow2.f32 %v2434_v6 }
 0x387   : > { %v2866_v28 = vpop.eup %2865 }
 0x388   : > { %v2173_v51 = vadd.f32 1.0, %v2866_v28  ;;  %v2883_v28 = vld [vmem:[%s2991_s20 + $0x40] sm:$0xff] }
 0x38a   : > { %2867 = vrcp.f32 %v2173_v51 }
 0x397   : > { %v2868_v24 = vpop.eup %2867 }
 0x398   : > { %v2176_v37 = vmul.f32 %v2868_v24, %v2169_v49  ;;  %v2882_v49 = vld [vmem:[%s2991_s20 + $0x38] sm:$0xff]  ;;  %v2884_v24 = vld [vmem:[%s2991_s20 + $0x48] sm:$0xff] }
 0x39a   : > { %v2178_v47 = vmul.f32 %v2177_v54, %v2176_v37  ;;  %v2885_v37 = vld [vmem:[%s2991_s20 + $0x50] sm:$0xff] }
 0x39c   : > { %v2179_v22 = vrot.slane %v2178_v47, 4 }
 0x39e   : > { %v2180_v56 = vadd.f32 %v2179_v22, %v2178_v47  ;;  %v2886_v22 = vld [vmem:[%s2991_s20 + $0x58] sm:$0xff] }
 0x3a0   : > { %v2181_v5 = vrot.slane %v2180_v56, 2 }
 0x3a2   : > { %v2182_v29 = vadd.f32 %v2181_v5, %v2180_v56  ;;  %v2887_v5 = vld [vmem:[%s2991_s20 + $0x60] sm:$0xff] }
 0x3a4   : > { %v2183_v50 = vrot.slane %v2182_v29, 1 }
 0x3a6   : > { %v2184_v17 = vadd.f32 %v2183_v50, %v2182_v29  ;;  %v2888_v50 = vld [vmem:[%s2991_s20 + $0x68] sm:$0xff] }
 0x3a8   : > { %v2435_v31 = vmul.f32 -1.442695, %v2184_v17 }
 0x3aa   : > { %2869 = vpow2.f32 %v2435_v31  ;;  %v2889_v31 = vld [vmem:[%s2991_s20 + $0x70] sm:$0xff] }
 0x3b7   : > { %v2870_v34 = vpop.eup %2869 }
 0x3b8   : > { %v2188_v23 = vadd.f32 1.0, %v2870_v34 }
 0x3ba   : > { %2871 = vrcp.f32 %v2188_v23  ;;  %v2890_v23 = vld [vmem:[%s2991_s20 + $0x78] sm:$0xff] }
 0x3c7   : > { %v2872_v60 = vpop.eup %2871 }
 0x3c8   : > { %v2191_v21 = vmul.f32 %v2872_v60, %v4226_v57  ;;  %v2192_v12 = vmul.f32 %v2872_v60, %v4223_v20  ;;  %v2193_v18 = vmul.f32 %v2872_v60, %v4231_v1  ;;  %v2194_v58 = vmul.f32 %v2872_v60, %v4235_v43 }
 0x3c9   : > { %v2195_v33 = vmul.f32 %v2872_v60, %v4239_v39  ;;  %v2196_v55 = vmul.f32 %v2872_v60, %v4243_v16  ;;  %v2197_v14 = vmul.f32 %v2872_v60, %v4247_v61  ;;  %v2198_v10 = vmul.f32 %v2872_v60, %v4251_v15 }
 0x3ca   : > { %v2199_v8 = vmul.f32 %v2872_v60, %v4255_v53  ;;  %v2200_v27 = vmul.f32 %v2872_v60, %v4259_v38  ;;  %v2201_v57 = vmul.f32 %v2872_v60, %v4263_v42  ;;  %v2202_v20 = vmul.f32 %v2872_v60, %v4267_v7 }
 0x3cb   : > { %v2203_v1 = vmul.f32 %v2872_v60, %v4271_v41  ;;  %v2204_v43 = vmul.f32 %v2872_v60, %v4275_v35  ;;  %v2205_v39 = vmul.f32 %v2872_v60, %v4279_v19  ;;  %v2206_v16 = vmul.f32 %v2872_v60, %v4283_v2 }
 0x3cc   : > { %v2207_v61 = vmul.f32 %v2872_v60, %v4287_v59  ;;  %v2208_v15 = vmul.f32 %v2872_v60, %v4291_v3  ;;  %v2209_v53 = vmul.f32 %v2872_v60, %v4295_v26  ;;  %v2210_v38 = vmul.f32 %v2872_v60, %v4299_v11 }
 0x3cd   : > { %v4377_v42 = vmul.f32 %v2872_v60, %v4303_v62  ;;  %v4380_v7 = vmul.f32 %v2872_v60, %v4307_v52  ;;  %v4383_v41 = vmul.f32 %v2872_v60, %v4311_v46  ;;  %v4386_v35 = vmul.f32 %v2872_v60, %v4315_v13  ;;  %v2875_v46 = vld [vmem:[%s2991_s20] sm:$0xff] }
 0x3ce   : > { %v4389_v19 = vmul.f32 %v2872_v60, %v4319_v48  ;;  %v4392_v2 = vmul.f32 %v2872_v60, %v4323_v4  ;;  %v4395_v59 = vmul.f32 %v2872_v60, %v4327_v30  ;;  %v4398_v3 = vmul.f32 %v2872_v60, %v4331_v44  ;;  %v2876_v48 = vld [vmem:[%s2991_s20 + $0x8] sm:$0xff]  ;;  %v2877_v30 = vld [vmem:[%s2991_s20 + $0x10] sm:$0xff] }
 0x3cf   : > { %v4408_v26 = vmul.f32 %v2872_v60, %v4335_v9  ;;  %v4411_v11 = vmul.f32 %v2872_v60, %v4339_v40  ;;  %v4414_v62 = vmul.f32 %v2872_v60, %v4342_v0  ;;  %v4417_v52 = vmul.f32 %v2872_v60, %v4346_v32  ;;  %v2878_v9 = vld [vmem:[%s2991_s20 + $0x18] sm:$0xff] }
 0x3d0   : > { %v2223_v13 = vadd.f32 %v2875_v46, %v2191_v21  ;;  %v2224_v4 = vadd.f32 %v2876_v48, %v2192_v12  ;;  %v2225_v44 = vadd.f32 %v2877_v30, %v2193_v18  ;;  %v2226_v40 = vadd.f32 %v2878_v9, %v2194_v58  ;;  %v2891_v21 = vld [vmem:[%s2991_s20 + $0x80] sm:$0xff]  ;;  %v2892_v18 = vld [vmem:[%s2991_s20 + $0x88] sm:$0xff]  ;;  %v2906_v48 = vld [vmem:[%s2991_s20 + $0xf8] sm:$0xff] }
 0x3d1   : > { %v2227_v0 = vadd.f32 %v2879_v63, %v2195_v33  ;;  %v2228_v32 = vadd.f32 %v2880_v25, %v2196_v55  ;;  %v2229_v45 = vadd.f32 %v2881_v36, %v2197_v14  ;;  %v2230_v6 = vadd.f32 %v2882_v49, %v2198_v10  ;;  %v2893_v33 = vld [vmem:[%s2991_s20 + $0x90] sm:$0xff]  ;;  %v2894_v14 = vld [vmem:[%s2991_s20 + $0x98] sm:$0xff] }
 0x3d2   : > { %v2231_v51 = vadd.f32 %v2883_v28, %v2199_v8  ;;  %v2232_v54 = vadd.f32 %v2884_v24, %v2200_v27  ;;  %v2233_v47 = vadd.f32 %v2885_v37, %v2201_v57  ;;  %v2234_v56 = vadd.f32 %v2886_v22, %v2202_v20  ;;  %2255 = vst [vmem:[%s4405_s14] sm:$0xff] %v2223_v13  ;;  %v2895_v8 = vld [vmem:[%s2991_s20 + $0xa0] sm:$0xff]  ;;  %v2896_v57 = vld [vmem:[%s2991_s20 + $0xa8] sm:$0xff] }
 0x3d3   : > { %2256 = vst [vmem:[%s4405_s14 + $0x8] sm:$0xff] %v2224_v4  ;;  %2257 = vst [vmem:[%s4405_s14 + $0x10] sm:$0xff] %v2225_v44  ;;  %v2235_v29 = vadd.f32 %v2887_v5, %v2203_v1  ;;  %v2236_v17 = vadd.f32 %v2888_v50, %v2204_v43  ;;  %v2237_v34 = vadd.f32 %v2889_v31, %v2205_v39  ;;  %v2897_v1 = vld [vmem:[%s2991_s20 + $0xb0] sm:$0xff]  ;;  %v2898_v39 = vld [vmem:[%s2991_s20 + $0xb8] sm:$0xff] }
 0x3d4   : > { %2258 = vst [vmem:[%s4405_s14 + $0x18] sm:$0xff] %v2226_v40  ;;  %v2238_v60 = vadd.f32 %v2890_v23, %v2206_v16  ;;  %2259 = vst [vmem:[%s4405_s14 + $0x20] sm:$0xff] %v2227_v0  ;;  %v2239_v12 = vadd.f32 %v2891_v21, %v2207_v61  ;;  %v2240_v58 = vadd.f32 %v2892_v18, %v2208_v15  ;;  %v2899_v61 = vld [vmem:[%s2991_s20 + $0xc0] sm:$0xff] }
 0x3d5   : > { %2260 = vst [vmem:[%s4405_s14 + $0x28] sm:$0xff] %v2228_v32  ;;  %2261 = vst [vmem:[%s4405_s14 + $0x30] sm:$0xff] %v2229_v45  ;;  %v2241_v55 = vadd.f32 %v2893_v33, %v2209_v53  ;;  %v2242_v10 = vadd.f32 %v2894_v14, %v2210_v38  ;;  %v2243_v27 = vadd.f32 %v2895_v8, %v4377_v42  ;;  %v2900_v53 = vld [vmem:[%s2991_s20 + $0xc8] sm:$0xff]  ;;  %v2901_v42 = vld [vmem:[%s2991_s20 + $0xd0] sm:$0xff] }
 0x3d6   : > { %2262 = vst [vmem:[%s4405_s14 + $0x38] sm:$0xff] %v2230_v6  ;;  %2263 = vst [vmem:[%s4405_s14 + $0x40] sm:$0xff] %v2231_v51  ;;  %v2244_v20 = vadd.f32 %v2896_v57, %v4380_v7  ;;  %v2245_v43 = vadd.f32 %v2897_v1, %v4383_v41  ;;  %v2246_v16 = vadd.f32 %v2898_v39, %v4386_v35  ;;  %v2902_v41 = vld [vmem:[%s2991_s20 + $0xd8] sm:$0xff] }
 0x3d7   : > { %2264 = vst [vmem:[%s4405_s14 + $0x48] sm:$0xff] %v2232_v54  ;;  %2265 = vst [vmem:[%s4405_s14 + $0x50] sm:$0xff] %v2233_v47  ;;  %v2247_v15 = vadd.f32 %v2899_v61, %v4389_v19  ;;  %v2248_v38 = vadd.f32 %v2900_v53, %v4392_v2  ;;  %v2249_v7 = vadd.f32 %v2901_v42, %v4395_v59  ;;  %v2903_v19 = vld [vmem:[%s2991_s20 + $0xe0] sm:$0xff]  ;;  %v2904_v59 = vld [vmem:[%s2991_s20 + $0xe8] sm:$0xff] }
 0x3d8   : > { %2266 = vst [vmem:[%s4405_s14 + $0x58] sm:$0xff] %v2234_v56  ;;  %2267 = vst [vmem:[%s4405_s14 + $0x60] sm:$0xff] %v2235_v29  ;;  %v2250_v35 = vadd.f32 %v2902_v41, %v4398_v3  ;;  %v2251_v2 = vadd.f32 %v2903_v19, %v4408_v26  ;;  %v2252_v46 = vadd.f32 %v2904_v59, %v4411_v11  ;;  %v2905_v3 = vld [vmem:[%s2991_s20 + $0xf0] sm:$0xff] }
 0x3d9   : > { %2268 = vst [vmem:[%s4405_s14 + $0x68] sm:$0xff] %v2236_v17  ;;  %2269 = vst [vmem:[%s4405_s14 + $0x70] sm:$0xff] %v2237_v34  ;;  %v2253_v13 = vadd.f32 %v2905_v3, %v4414_v62  ;;  %v2254_v4 = vadd.f32 %v2906_v48, %v4417_v52 }
 0x3da   : > { %2270 = vst [vmem:[%s4405_s14 + $0x78] sm:$0xff] %v2238_v60  ;;  %2271 = vst [vmem:[%s4405_s14 + $0x80] sm:$0xff] %v2239_v12 }
 0x3db   : > { %2272 = vst [vmem:[%s4405_s14 + $0x88] sm:$0xff] %v2240_v58  ;;  %2273 = vst [vmem:[%s4405_s14 + $0x90] sm:$0xff] %v2241_v55 }
 0x3dc   : > { %2274 = vst [vmem:[%s4405_s14 + $0x98] sm:$0xff] %v2242_v10  ;;  %2275 = vst [vmem:[%s4405_s14 + $0xa0] sm:$0xff] %v2243_v27 }
 0x3dd   : > { %2276 = vst [vmem:[%s4405_s14 + $0xa8] sm:$0xff] %v2244_v20  ;;  %2277 = vst [vmem:[%s4405_s14 + $0xb0] sm:$0xff] %v2245_v43 }
 0x3de   : > { %2278 = vst [vmem:[%s4405_s14 + $0xb8] sm:$0xff] %v2246_v16  ;;  %2279 = vst [vmem:[%s4405_s14 + $0xc0] sm:$0xff] %v2247_v15 }
 0x3df   : > { %2280 = vst [vmem:[%s4405_s14 + $0xc8] sm:$0xff] %v2248_v38  ;;  %2281 = vst [vmem:[%s4405_s14 + $0xd0] sm:$0xff] %v2249_v7 }
 0x3e0   : > { %2282 = vst [vmem:[%s4405_s14 + $0xd8] sm:$0xff] %v2250_v35  ;;  %2283 = vst [vmem:[%s4405_s14 + $0xe0] sm:$0xff] %v2251_v2 }
 0x3e1   : > { %2284 = vst [vmem:[%s4405_s14 + $0xe8] sm:$0xff] %v2252_v46  ;;  %2285 = vst [vmem:[%s4405_s14 + $0xf0] sm:$0xff] %v2253_v13 }
 0x3e2   : > { %2286 = vst [vmem:[%s4405_s14 + $0xf8] sm:$0xff] %v2254_v4 }
 0x3e3 PF: > { %s19_s30 = sadd.s32 1, %s2913_s30  }
 0x3e4   : > { %p16_p4 = scmp.ge.s32.totalorder %s19_s30, 4  }
 0x3e6   :  { %18 = sbr.rel (!%p16_p4) target bundleno = 1 (0x1), region = 87 }

</bundles_post_ra>
